<compile_context>
chip_gen: v7x
topology: tpu7x:2x2x1
jax: 0.10.0
libtpu: 0.0.40
codegen_flags: <defaults>
</compile_context>

<pallas_src>
import functools

import jax
import jax.numpy as jnp
from jax import lax
from jax.experimental import pallas as pl
from jax.experimental.pallas import tpu as pltpu


def _round_up(x, m):
    return (x + m - 1) // m * m


def _gru_chunk_kernel(x_ref, wih_ref, whh_ref, bpre_ref, bloop_ref,
                      out_ref, h_ref, gi_ref, *, hp, tc):
    """One grid step == one chunk of `tc` timesteps.

    x_ref   : (tc, Bp, Hp)   time-major padded inputs for this chunk
    wih_ref : (Hp, 3*Hp)     W_ih^T, gate-blocked & zero-padded (resident)
    whh_ref : (Hp, 3*Hp)     W_hh^T, gate-blocked & zero-padded (resident)
    bpre_ref: (1, 3*Hp)      b_ih + [b_hh_r, b_hh_z, 0]   (folded into gi)
    bloop_ref:(1, 3*Hp)      [0, 0, b_hh_n]               (stays in the loop)
    out_ref : (tc, Bp, Hp)   hidden states for this chunk (lane-dense store)
    h_ref   : (Bp, Hp)       hidden-state carry across chunks (VMEM scratch)
    gi_ref  : (tc, Bp, 3*Hp) hoisted input projection (VMEM scratch)
    """
    c = pl.program_id(0)

    @pl.when(c == 0)
    def _():
        h_ref[...] = jnp.zeros_like(h_ref)

    # ---- Prologue: input projection for ALL timesteps of the chunk in one
    # MXU matmul (off the serial critical path). -----------------------------
    t_blk, b_pad = x_ref.shape[0], x_ref.shape[1]
    x = x_ref[...].reshape(t_blk * b_pad, hp)                       # (tc*Bp, Hp)
    gi = jnp.dot(x, wih_ref[...], preferred_element_type=jnp.float32)
    gi = gi + bpre_ref[...]                                         # bias folded once
    gi_ref[...] = gi.reshape(t_blk, b_pad, 3 * hp)

    whh = whh_ref[...]                                              # resident weights
    b_loop = bloop_ref[...]

    # ---- Serial recurrence: only the h-projection matmul + gates remain. ---
    def step(t, h):
        gi_t = gi_ref[t]                                            # (Bp, 3*Hp)
        gh = jnp.dot(h, whh, preferred_element_type=jnp.float32) + b_loop
        r = jax.nn.sigmoid(gi_t[:, 0 * hp:1 * hp] + gh[:, 0 * hp:1 * hp])
        z = jax.nn.sigmoid(gi_t[:, 1 * hp:2 * hp] + gh[:, 1 * hp:2 * hp])
        n = jnp.tanh(gi_t[:, 2 * hp:3 * hp] + r * gh[:, 2 * hp:3 * hp])
        h_new = (1.0 - z) * n + z * h
        out_ref[t] = h_new.astype(out_ref.dtype)                    # (8,128) full-vreg store
        return h_new

    h_final = lax.fori_loop(0, tc, step, h_ref[...], unroll=True)
    h_ref[...] = h_final


def rnn_decoder_forward(m_enc, weight_ih, weight_hh, bias_ih, bias_hh,
                        *, time_chunk=None):
    """m_enc: (B, T, H) float32.  Returns (B, T, H) float32 (matches PyTorch)."""
    B, T, H = m_enc.shape
    assert weight_ih.shape == (3 * H, H)
    assert weight_hh.shape == (3 * H, H)

    Hp = _round_up(H, 128)           # lane-aligned hidden size
    Bp = _round_up(B, 8)             # sublane-aligned batch
    if time_chunk is None:
        time_chunk = min(T, 64)
    TC = time_chunk
    Tp = _round_up(T, TC)
    n_chunks = Tp // TC

    # Time-major, zero-padded input staging (single small XLA pass).
    x = jnp.transpose(m_enc, (1, 0, 2)).astype(jnp.float32)          # (T, B, H)
    x = jnp.pad(x, ((0, Tp - T), (0, Bp - B), (0, Hp - H)))          # (Tp, Bp, Hp)

    def _pad_gate_weight_t(w):
        # w: (3H, H) gate-major rows -> (Hp, 3*Hp) with each gate's W^T in the
        # top-left (H, H) corner of its 128-lane-aligned column block.
        blocks = []
        for g in range(3):
            blk = jnp.transpose(w[g * H:(g + 1) * H, :])             # (H_in, H_out)
            blocks.append(jnp.pad(blk, ((0, Hp - H), (0, Hp - H))))
        return jnp.concatenate(blocks, axis=1).astype(jnp.float32)   # (Hp, 3Hp)

    def _pad_gate_bias(b):
        return jnp.concatenate(
            [jnp.pad(b[g * H:(g + 1) * H], (0, Hp - H)) for g in range(3)]
        ).astype(jnp.float32)                                        # (3Hp,)

    wih_p = _pad_gate_weight_t(weight_ih)
    whh_p = _pad_gate_weight_t(weight_hh)
    bih_p = _pad_gate_bias(bias_ih)
    bhh_p = _pad_gate_bias(bias_hh)

    # Fold b_ih and the r/z portions of b_hh into the hoisted gi; keep only the
    # n-gate portion of b_hh (it sits under the r*(...) multiply) in the loop.
    zeros_h = jnp.zeros((Hp,), jnp.float32)
    b_pre = (bih_p + jnp.concatenate([bhh_p[:2 * Hp], zeros_h])).reshape(1, 3 * Hp)
    b_loop = jnp.concatenate([zeros_h, zeros_h, bhh_p[2 * Hp:]]).reshape(1, 3 * Hp)

    kernel = functools.partial(_gru_chunk_kernel, hp=Hp, tc=TC)

    out_tbh = pl.pallas_call(
        kernel,
        out_shape=jax.ShapeDtypeStruct((Tp, Bp, Hp), jnp.float32),
        grid=(n_chunks,),
        in_specs=[
            pl.BlockSpec((TC, Bp, Hp), lambda c: (c, 0, 0)),     # x chunk
            pl.BlockSpec((Hp, 3 * Hp), lambda c: (0, 0)),        # W_ih^T (resident)
            pl.BlockSpec((Hp, 3 * Hp), lambda c: (0, 0)),        # W_hh^T (resident)
            pl.BlockSpec((1, 3 * Hp), lambda c: (0, 0)),         # folded bias (pre)
            pl.BlockSpec((1, 3 * Hp), lambda c: (0, 0)),         # loop bias (n gate)
        ],
        out_specs=pl.BlockSpec((TC, Bp, Hp), lambda c: (c, 0, 0)),
        scratch_shapes=[
            pltpu.VMEM((Bp, Hp), jnp.float32),                   # hidden-state carry
            pltpu.VMEM((TC, Bp, 3 * Hp), jnp.float32),           # hoisted gi chunk
        ],
        compiler_params=pltpu.CompilerParams(
            dimension_semantics=("arbitrary",),                  # sequential over time chunks
            vmem_limit_bytes=64 * 1024 * 1024),
    )(x, wih_p, whh_p, b_pre, b_loop)

    # Strip padding, back to (B, T, H).
    return jnp.transpose(out_tbh[:T, :B, :H], (1, 0, 2))


def _reference_forward(m_enc, weight_ih, weight_hh, bias_ih, bias_hh):
    """Pure-JAX reference mirroring the PyTorch GRUCell loop."""
    B, T, H = m_enc.shape

    def step(h, x_t):
        gi = x_t @ weight_ih.T + bias_ih
        gh = h @ weight_hh.T + bias_hh
        r = jax.nn.sigmoid(gi[:, :H] + gh[:, :H])
        z = jax.nn.sigmoid(gi[:, H:2 * H] + gh[:, H:2 * H])
        n = jnp.tanh(gi[:, 2 * H:] + r * gh[:, 2 * H:])
        h_new = (1.0 - z) * n + z * h
        return h_new, h_new

    h0 = jnp.zeros((B, H), jnp.float32)
    _, ys = lax.scan(step, h0, jnp.transpose(m_enc, (1, 0, 2)))
    return jnp.transpose(ys, (1, 0, 2))


def _init_params(key, hidden):
    """Deterministic parameter init matching the module's init_w_b()."""
    k_ih, k_hh = jax.random.split(key)
    # xavier_normal_ on weight_ih (3H, H): std = sqrt(2 / (fan_in + fan_out))
    fan_in, fan_out = hidden, 3 * hidden
    std = (2.0 / (fan_in + fan_out)) ** 0.5
    weight_ih = std * jax.random.normal(k_ih, (3 * hidden, hidden), jnp.float32)
    # orthogonal_ on weight_hh (3H, H): QR of a gaussian, semi-orthogonal rows.
    a = jax.random.normal(k_hh, (3 * hidden, hidden), jnp.float32)
    q, r = jnp.linalg.qr(a)
    q = q * jnp.sign(jnp.diagonal(r))[None, :]
    weight_hh = q
    bias_ih = jnp.zeros((3 * hidden,), jnp.float32)
    bias_hh = jnp.zeros((3 * hidden,), jnp.float32)
    return weight_ih, weight_hh, bias_ih, bias_hh


if __name__ == "__main__":
    B, T, H = 2, 8, 32   # batch, sequence_length, input_size (== hidden size)

    key = jax.random.PRNGKey(0)
    k_x, k_p = jax.random.split(key)
    m_enc = jax.random.normal(k_x, (B, T, H), jnp.float32)
    weight_ih, weight_hh, bias_ih, bias_hh = _init_params(k_p, H)

    out = rnn_decoder_forward(m_enc, weight_ih, weight_hh, bias_ih, bias_hh)
    out = jax.block_until_ready(out)

    ref = _reference_forward(m_enc, weight_ih, weight_hh, bias_ih, bias_hh)
    assert out.shape == (B, T, H)
    assert jnp.allclose(out, ref, atol=1e-5, rtol=1e-5), "mismatch vs reference"

    print("KERNEL_OK")
</pallas_src>

<mosaic_0001>
module attributes {stable_mosaic.version = 11 : i64} {
  func.func @_gru_chunk_kernel(%arg0: i32, %arg1: memref<8x8x128xf32, #tpu.memory_space<vmem>>, %arg2: memref<128x384xf32, #tpu.memory_space<vmem>>, %arg3: memref<128x384xf32, #tpu.memory_space<vmem>>, %arg4: memref<1x384xf32, #tpu.memory_space<vmem>>, %arg5: memref<1x384xf32, #tpu.memory_space<vmem>>, %arg6: memref<8x8x128xf32, #tpu.memory_space<vmem>>, %arg7: memref<8x128xf32, #tpu.memory_space<vmem>>, %arg8: memref<8x8x384xf32, #tpu.memory_space<vmem>>) attributes {dimension_semantics = [#tpu.dimension_semantics<arbitrary>], iteration_bounds = array<i64: 1>, scalar_prefetch = 0 : i64, scratch_operands = 2 : i64, tpu.core_type = #tpu.core_type<tc>, window_params = [{transform_indices = @transform_0, window_bounds = array<i64: 8, 8, 128>}, {pipeline_mode = #tpu.pipeline_mode<synchronous>, transform_indices = @transform_1, window_bounds = array<i64: 128, 384>}, {pipeline_mode = #tpu.pipeline_mode<synchronous>, transform_indices = @transform_2, window_bounds = array<i64: 128, 384>}, {pipeline_mode = #tpu.pipeline_mode<synchronous>, transform_indices = @transform_3, window_bounds = array<i64: 1, 384>}, {pipeline_mode = #tpu.pipeline_mode<synchronous>, transform_indices = @transform_4, window_bounds = array<i64: 1, 384>}, {transform_indices = @transform_5, window_bounds = array<i64: 8, 8, 128>}]} {
    %c0_i32 = arith.constant 0 : i32
    %0 = arith.cmpi eq, %arg0, %c0_i32 : i32
    %1 = arith.extui %0 : i1 to i32
    %c0_i32_0 = arith.constant 0 : i32
    %2 = arith.cmpi ne, %1, %c0_i32_0 : i32
    scf.if %2 {
      %cst_83 = arith.constant 0.000000e+00 : f32
      %304 = vector.broadcast %cst_83 : f32 to vector<8x128xf32>
      %c0_84 = arith.constant 0 : index
      %c0_85 = arith.constant 0 : index
      %305 = vector.load %arg7[%c0_84, %c0_85] : memref<8x128xf32, #tpu.memory_space<vmem>>, vector<8x128xf32>
      tpu.vector_store %arg7[%c0_84, %c0_85], %304 {strides = array<i32>} : memref<8x128xf32, #tpu.memory_space<vmem>>, vector<8x128xf32>,
    } else {
    }
    %c0 = arith.constant 0 : index
    %c0_1 = arith.constant 0 : index
    %c0_2 = arith.constant 0 : index
    %3 = vector.load %arg1[%c0, %c0_1, %c0_2] : memref<8x8x128xf32, #tpu.memory_space<vmem>>, vector<8x8x128xf32>
    %4 = vector.shape_cast %3 : vector<8x8x128xf32> to vector<64x128xf32>
    %c0_3 = arith.constant 0 : index
    %c0_4 = arith.constant 0 : index
    %5 = vector.load %arg2[%c0_3, %c0_4] : memref<128x384xf32, #tpu.memory_space<vmem>>, vector<128x384xf32>
    %cst = arith.constant dense<0.000000e+00> : vector<64x384xf32>
    %6 = tpu.matmul %4, %5, %cst {dimension_numbers = #tpu.dot_dimension_numbers<[1], [0], [0], [1], [0, 0, 1, 1], [], []>} : vector<64x128xf32>, vector<128x384xf32>, vector<64x384xf32> -> vector<64x384xf32>
    %c0_5 = arith.constant 0 : index
    %c0_6 = arith.constant 0 : index
    %7 = vector.load %arg4[%c0_5, %c0_6] : memref<1x384xf32, #tpu.memory_space<vmem>>, vector<1x384xf32>
    %8 = vector.broadcast %7 : vector<1x384xf32> to vector<64x384xf32>
    %9 = arith.addf %6, %8 : vector<64x384xf32>
    %10 = vector.shape_cast %9 : vector<64x384xf32> to vector<8x8x384xf32>
    %c0_7 = arith.constant 0 : index
    %c0_8 = arith.constant 0 : index
    %c0_9 = arith.constant 0 : index
    %11 = vector.load %arg8[%c0_7, %c0_8, %c0_9] : memref<8x8x384xf32, #tpu.memory_space<vmem>>, vector<8x8x384xf32>
    tpu.vector_store %arg8[%c0_7, %c0_8, %c0_9], %10 {strides = array<i32>} : memref<8x8x384xf32, #tpu.memory_space<vmem>>, vector<8x8x384xf32>,
    %c0_10 = arith.constant 0 : index
    %c0_11 = arith.constant 0 : index
    %12 = vector.load %arg3[%c0_10, %c0_11] : memref<128x384xf32, #tpu.memory_space<vmem>>, vector<128x384xf32>
    %c0_12 = arith.constant 0 : index
    %c0_13 = arith.constant 0 : index
    %13 = vector.load %arg5[%c0_12, %c0_13] : memref<1x384xf32, #tpu.memory_space<vmem>>, vector<1x384xf32>
    %c0_14 = arith.constant 0 : index
    %c0_15 = arith.constant 0 : index
    %14 = vector.load %arg7[%c0_14, %c0_15] : memref<8x128xf32, #tpu.memory_space<vmem>>, vector<8x128xf32>
    %c0_i32_16 = arith.constant 0 : i32
    %15 = arith.index_cast %c0_i32_16 : i32 to index
    %c0_17 = arith.constant 0 : index
    %c0_18 = arith.constant 0 : index
    %16 = vector.load %arg8[%15, %c0_17, %c0_18] : memref<8x8x384xf32, #tpu.memory_space<vmem>>, vector<1x8x384xf32>
    %17 = vector.shape_cast %16 : vector<1x8x384xf32> to vector<8x384xf32>
    %cst_19 = arith.constant dense<0.000000e+00> : vector<8x384xf32>
    %18 = tpu.matmul %14, %12, %cst_19 {dimension_numbers = #tpu.dot_dimension_numbers<[1], [0], [0], [1], [0, 0, 1, 1], [], []>} : vector<8x128xf32>, vector<128x384xf32>, vector<8x384xf32> -> vector<8x384xf32>
    %19 = vector.broadcast %13 : vector<1x384xf32> to vector<8x384xf32>
    %20 = arith.addf %18, %19 : vector<8x384xf32>
    %21 = vector.extract_strided_slice %17 {offsets = [0, 0], sizes = [8, 128], strides = [1, 1]} : vector<8x384xf32> to vector<8x128xf32>
    %22 = vector.extract_strided_slice %20 {offsets = [0, 0], sizes = [8, 128], strides = [1, 1]} : vector<8x384xf32> to vector<8x128xf32>
    %23 = arith.addf %21, %22 : vector<8x128xf32>
    %24 = arith.negf %23 : vector<8x128xf32>
    %25 = math.exp %24 : vector<8x128xf32>
    %cst_20 = arith.constant 1.000000e+00 : f32
    %26 = vector.broadcast %cst_20 : f32 to vector<8x128xf32>
    %27 = arith.addf %26, %25 : vector<8x128xf32>
    %28 = arith.divf %26, %27 : vector<8x128xf32>
    %29 = vector.extract_strided_slice %17 {offsets = [0, 128], sizes = [8, 128], strides = [1, 1]} : vector<8x384xf32> to vector<8x128xf32>
    %30 = vector.extract_strided_slice %20 {offsets = [0, 128], sizes = [8, 128], strides = [1, 1]} : vector<8x384xf32> to vector<8x128xf32>
    %31 = arith.addf %29, %30 : vector<8x128xf32>
    %32 = arith.negf %31 : vector<8x128xf32>
    %33 = math.exp %32 : vector<8x128xf32>
    %cst_21 = arith.constant 1.000000e+00 : f32
    %34 = vector.broadcast %cst_21 : f32 to vector<8x128xf32>
    %35 = arith.addf %34, %33 : vector<8x128xf32>
    %36 = arith.divf %34, %35 : vector<8x128xf32>
    %37 = vector.extract_strided_slice %17 {offsets = [0, 256], sizes = [8, 128], strides = [1, 1]} : vector<8x384xf32> to vector<8x128xf32>
    %38 = vector.extract_strided_slice %20 {offsets = [0, 256], sizes = [8, 128], strides = [1, 1]} : vector<8x384xf32> to vector<8x128xf32>
    %39 = arith.mulf %28, %38 : vector<8x128xf32>
    %40 = arith.addf %37, %39 : vector<8x128xf32>
    %41 = math.tanh %40 : vector<8x128xf32>
    %cst_22 = arith.constant 1.000000e+00 : f32
    %42 = vector.broadcast %cst_22 : f32 to vector<8x128xf32>
    %43 = arith.subf %42, %36 : vector<8x128xf32>
    %44 = arith.mulf %43, %41 : vector<8x128xf32>
    %45 = arith.mulf %36, %14 : vector<8x128xf32>
    %46 = arith.addf %44, %45 : vector<8x128xf32>
    %47 = arith.index_cast %c0_i32_16 : i32 to index
    %c0_23 = arith.constant 0 : index
    %c0_24 = arith.constant 0 : index
    %48 = vector.load %arg6[%47, %c0_23, %c0_24] : memref<8x8x128xf32, #tpu.memory_space<vmem>>, vector<1x8x128xf32>
    %49 = vector.shape_cast %48 : vector<1x8x128xf32> to vector<8x128xf32>
    %50 = vector.shape_cast %46 : vector<8x128xf32> to vector<1x8x128xf32>
    tpu.vector_store %arg6[%47, %c0_23, %c0_24], %50 {strides = array<i32>} : memref<8x8x128xf32, #tpu.memory_space<vmem>>, vector<1x8x128xf32>,
    %c1_i32 = arith.constant 1 : i32
    %51 = arith.index_cast %c1_i32 : i32 to index
    %c0_25 = arith.constant 0 : index
    %c0_26 = arith.constant 0 : index
    %52 = vector.load %arg8[%51, %c0_25, %c0_26] : memref<8x8x384xf32, #tpu.memory_space<vmem>>, vector<1x8x384xf32>
    %53 = vector.shape_cast %52 : vector<1x8x384xf32> to vector<8x384xf32>
    %cst_27 = arith.constant dense<0.000000e+00> : vector<8x384xf32>
    %54 = tpu.matmul %46, %12, %cst_27 {dimension_numbers = #tpu.dot_dimension_numbers<[1], [0], [0], [1], [0, 0, 1, 1], [], []>} : vector<8x128xf32>, vector<128x384xf32>, vector<8x384xf32> -> vector<8x384xf32>
    %55 = vector.broadcast %13 : vector<1x384xf32> to vector<8x384xf32>
    %56 = arith.addf %54, %55 : vector<8x384xf32>
    %57 = vector.extract_strided_slice %53 {offsets = [0, 0], sizes = [8, 128], strides = [1, 1]} : vector<8x384xf32> to vector<8x128xf32>
    %58 = vector.extract_strided_slice %56 {offsets = [0, 0], sizes = [8, 128], strides = [1, 1]} : vector<8x384xf32> to vector<8x128xf32>
    %59 = arith.addf %57, %58 : vector<8x128xf32>
    %60 = arith.negf %59 : vector<8x128xf32>
    %61 = math.exp %60 : vector<8x128xf32>
    %cst_28 = arith.constant 1.000000e+00 : f32
    %62 = vector.broadcast %cst_28 : f32 to vector<8x128xf32>
    %63 = arith.addf %62, %61 : vector<8x128xf32>
    %64 = arith.divf %62, %63 : vector<8x128xf32>
    %65 = vector.extract_strided_slice %53 {offsets = [0, 128], sizes = [8, 128], strides = [1, 1]} : vector<8x384xf32> to vector<8x128xf32>
    %66 = vector.extract_strided_slice %56 {offsets = [0, 128], sizes = [8, 128], strides = [1, 1]} : vector<8x384xf32> to vector<8x128xf32>
    %67 = arith.addf %65, %66 : vector<8x128xf32>
    %68 = arith.negf %67 : vector<8x128xf32>
    %69 = math.exp %68 : vector<8x128xf32>
    %cst_29 = arith.constant 1.000000e+00 : f32
    %70 = vector.broadcast %cst_29 : f32 to vector<8x128xf32>
    %71 = arith.addf %70, %69 : vector<8x128xf32>
    %72 = arith.divf %70, %71 : vector<8x128xf32>
    %73 = vector.extract_strided_slice %53 {offsets = [0, 256], sizes = [8, 128], strides = [1, 1]} : vector<8x384xf32> to vector<8x128xf32>
    %74 = vector.extract_strided_slice %56 {offsets = [0, 256], sizes = [8, 128], strides = [1, 1]} : vector<8x384xf32> to vector<8x128xf32>
    %75 = arith.mulf %64, %74 : vector<8x128xf32>
    %76 = arith.addf %73, %75 : vector<8x128xf32>
    %77 = math.tanh %76 : vector<8x128xf32>
    %cst_30 = arith.constant 1.000000e+00 : f32
    %78 = vector.broadcast %cst_30 : f32 to vector<8x128xf32>
    %79 = arith.subf %78, %72 : vector<8x128xf32>
    %80 = arith.mulf %79, %77 : vector<8x128xf32>
    %81 = arith.mulf %72, %46 : vector<8x128xf32>
    %82 = arith.addf %80, %81 : vector<8x128xf32>
    %83 = arith.index_cast %c1_i32 : i32 to index
    %c0_31 = arith.constant 0 : index
    %c0_32 = arith.constant 0 : index
    %84 = vector.load %arg6[%83, %c0_31, %c0_32] : memref<8x8x128xf32, #tpu.memory_space<vmem>>, vector<1x8x128xf32>
    %85 = vector.shape_cast %84 : vector<1x8x128xf32> to vector<8x128xf32>
    %86 = vector.shape_cast %82 : vector<8x128xf32> to vector<1x8x128xf32>
    tpu.vector_store %arg6[%83, %c0_31, %c0_32], %86 {strides = array<i32>} : memref<8x8x128xf32, #tpu.memory_space<vmem>>, vector<1x8x128xf32>,
    %c2_i32 = arith.constant 2 : i32
    %87 = arith.index_cast %c2_i32 : i32 to index
    %c0_33 = arith.constant 0 : index
    %c0_34 = arith.constant 0 : index
    %88 = vector.load %arg8[%87, %c0_33, %c0_34] : memref<8x8x384xf32, #tpu.memory_space<vmem>>, vector<1x8x384xf32>
    %89 = vector.shape_cast %88 : vector<1x8x384xf32> to vector<8x384xf32>
    %cst_35 = arith.constant dense<0.000000e+00> : vector<8x384xf32>
    %90 = tpu.matmul %82, %12, %cst_35 {dimension_numbers = #tpu.dot_dimension_numbers<[1], [0], [0], [1], [0, 0, 1, 1], [], []>} : vector<8x128xf32>, vector<128x384xf32>, vector<8x384xf32> -> vector<8x384xf32>
    %91 = vector.broadcast %13 : vector<1x384xf32> to vector<8x384xf32>
    %92 = arith.addf %90, %91 : vector<8x384xf32>
    %93 = vector.extract_strided_slice %89 {offsets = [0, 0], sizes = [8, 128], strides = [1, 1]} : vector<8x384xf32> to vector<8x128xf32>
    %94 = vector.extract_strided_slice %92 {offsets = [0, 0], sizes = [8, 128], strides = [1, 1]} : vector<8x384xf32> to vector<8x128xf32>
    %95 = arith.addf %93, %94 : vector<8x128xf32>
    %96 = arith.negf %95 : vector<8x128xf32>
    %97 = math.exp %96 : vector<8x128xf32>
    %cst_36 = arith.constant 1.000000e+00 : f32
    %98 = vector.broadcast %cst_36 : f32 to vector<8x128xf32>
    %99 = arith.addf %98, %97 : vector<8x128xf32>
    %100 = arith.divf %98, %99 : vector<8x128xf32>
    %101 = vector.extract_strided_slice %89 {offsets = [0, 128], sizes = [8, 128], strides = [1, 1]} : vector<8x384xf32> to vector<8x128xf32>
    %102 = vector.extract_strided_slice %92 {offsets = [0, 128], sizes = [8, 128], strides = [1, 1]} : vector<8x384xf32> to vector<8x128xf32>
    %103 = arith.addf %101, %102 : vector<8x128xf32>
    %104 = arith.negf %103 : vector<8x128xf32>
    %105 = math.exp %104 : vector<8x128xf32>
    %cst_37 = arith.constant 1.000000e+00 : f32
    %106 = vector.broadcast %cst_37 : f32 to vector<8x128xf32>
    %107 = arith.addf %106, %105 : vector<8x128xf32>
    %108 = arith.divf %106, %107 : vector<8x128xf32>
    %109 = vector.extract_strided_slice %89 {offsets = [0, 256], sizes = [8, 128], strides = [1, 1]} : vector<8x384xf32> to vector<8x128xf32>
    %110 = vector.extract_strided_slice %92 {offsets = [0, 256], sizes = [8, 128], strides = [1, 1]} : vector<8x384xf32> to vector<8x128xf32>
    %111 = arith.mulf %100, %110 : vector<8x128xf32>
    %112 = arith.addf %109, %111 : vector<8x128xf32>
    %113 = math.tanh %112 : vector<8x128xf32>
    %cst_38 = arith.constant 1.000000e+00 : f32
    %114 = vector.broadcast %cst_38 : f32 to vector<8x128xf32>
    %115 = arith.subf %114, %108 : vector<8x128xf32>
    %116 = arith.mulf %115, %113 : vector<8x128xf32>
    %117 = arith.mulf %108, %82 : vector<8x128xf32>
    %118 = arith.addf %116, %117 : vector<8x128xf32>
    %119 = arith.index_cast %c2_i32 : i32 to index
    %c0_39 = arith.constant 0 : index
    %c0_40 = arith.constant 0 : index
    %120 = vector.load %arg6[%119, %c0_39, %c0_40] : memref<8x8x128xf32, #tpu.memory_space<vmem>>, vector<1x8x128xf32>
    %121 = vector.shape_cast %120 : vector<1x8x128xf32> to vector<8x128xf32>
    %122 = vector.shape_cast %118 : vector<8x128xf32> to vector<1x8x128xf32>
    tpu.vector_store %arg6[%119, %c0_39, %c0_40], %122 {strides = array<i32>} : memref<8x8x128xf32, #tpu.memory_space<vmem>>, vector<1x8x128xf32>,
    %c3_i32 = arith.constant 3 : i32
    %123 = arith.index_cast %c3_i32 : i32 to index
    %c0_41 = arith.constant 0 : index
    %c0_42 = arith.constant 0 : index
    %124 = vector.load %arg8[%123, %c0_41, %c0_42] : memref<8x8x384xf32, #tpu.memory_space<vmem>>, vector<1x8x384xf32>
    %125 = vector.shape_cast %124 : vector<1x8x384xf32> to vector<8x384xf32>
    %cst_43 = arith.constant dense<0.000000e+00> : vector<8x384xf32>
    %126 = tpu.matmul %118, %12, %cst_43 {dimension_numbers = #tpu.dot_dimension_numbers<[1], [0], [0], [1], [0, 0, 1, 1], [], []>} : vector<8x128xf32>, vector<128x384xf32>, vector<8x384xf32> -> vector<8x384xf32>
    %127 = vector.broadcast %13 : vector<1x384xf32> to vector<8x384xf32>
    %128 = arith.addf %126, %127 : vector<8x384xf32>
    %129 = vector.extract_strided_slice %125 {offsets = [0, 0], sizes = [8, 128], strides = [1, 1]} : vector<8x384xf32> to vector<8x128xf32>
    %130 = vector.extract_strided_slice %128 {offsets = [0, 0], sizes = [8, 128], strides = [1, 1]} : vector<8x384xf32> to vector<8x128xf32>
    %131 = arith.addf %129, %130 : vector<8x128xf32>
    %132 = arith.negf %131 : vector<8x128xf32>
    %133 = math.exp %132 : vector<8x128xf32>
    %cst_44 = arith.constant 1.000000e+00 : f32
    %134 = vector.broadcast %cst_44 : f32 to vector<8x128xf32>
    %135 = arith.addf %134, %133 : vector<8x128xf32>
    %136 = arith.divf %134, %135 : vector<8x128xf32>
    %137 = vector.extract_strided_slice %125 {offsets = [0, 128], sizes = [8, 128], strides = [1, 1]} : vector<8x384xf32> to vector<8x128xf32>
    %138 = vector.extract_strided_slice %128 {offsets = [0, 128], sizes = [8, 128], strides = [1, 1]} : vector<8x384xf32> to vector<8x128xf32>
    %139 = arith.addf %137, %138 : vector<8x128xf32>
    %140 = arith.negf %139 : vector<8x128xf32>
    %141 = math.exp %140 : vector<8x128xf32>
    %cst_45 = arith.constant 1.000000e+00 : f32
    %142 = vector.broadcast %cst_45 : f32 to vector<8x128xf32>
    %143 = arith.addf %142, %141 : vector<8x128xf32>
    %144 = arith.divf %142, %143 : vector<8x128xf32>
    %145 = vector.extract_strided_slice %125 {offsets = [0, 256], sizes = [8, 128], strides = [1, 1]} : vector<8x384xf32> to vector<8x128xf32>
    %146 = vector.extract_strided_slice %128 {offsets = [0, 256], sizes = [8, 128], strides = [1, 1]} : vector<8x384xf32> to vector<8x128xf32>
    %147 = arith.mulf %136, %146 : vector<8x128xf32>
    %148 = arith.addf %145, %147 : vector<8x128xf32>
    %149 = math.tanh %148 : vector<8x128xf32>
    %cst_46 = arith.constant 1.000000e+00 : f32
    %150 = vector.broadcast %cst_46 : f32 to vector<8x128xf32>
    %151 = arith.subf %150, %144 : vector<8x128xf32>
    %152 = arith.mulf %151, %149 : vector<8x128xf32>
    %153 = arith.mulf %144, %118 : vector<8x128xf32>
    %154 = arith.addf %152, %153 : vector<8x128xf32>
    %155 = arith.index_cast %c3_i32 : i32 to index
    %c0_47 = arith.constant 0 : index
    %c0_48 = arith.constant 0 : index
    %156 = vector.load %arg6[%155, %c0_47, %c0_48] : memref<8x8x128xf32, #tpu.memory_space<vmem>>, vector<1x8x128xf32>
    %157 = vector.shape_cast %156 : vector<1x8x128xf32> to vector<8x128xf32>
    %158 = vector.shape_cast %154 : vector<8x128xf32> to vector<1x8x128xf32>
    tpu.vector_store %arg6[%155, %c0_47, %c0_48], %158 {strides = array<i32>} : memref<8x8x128xf32, #tpu.memory_space<vmem>>, vector<1x8x128xf32>,
    %c4_i32 = arith.constant 4 : i32
    %159 = arith.index_cast %c4_i32 : i32 to index
    %c0_49 = arith.constant 0 : index
    %c0_50 = arith.constant 0 : index
    %160 = vector.load %arg8[%159, %c0_49, %c0_50] : memref<8x8x384xf32, #tpu.memory_space<vmem>>, vector<1x8x384xf32>
    %161 = vector.shape_cast %160 : vector<1x8x384xf32> to vector<8x384xf32>
    %cst_51 = arith.constant dense<0.000000e+00> : vector<8x384xf32>
    %162 = tpu.matmul %154, %12, %cst_51 {dimension_numbers = #tpu.dot_dimension_numbers<[1], [0], [0], [1], [0, 0, 1, 1], [], []>} : vector<8x128xf32>, vector<128x384xf32>, vector<8x384xf32> -> vector<8x384xf32>
    %163 = vector.broadcast %13 : vector<1x384xf32> to vector<8x384xf32>
    %164 = arith.addf %162, %163 : vector<8x384xf32>
    %165 = vector.extract_strided_slice %161 {offsets = [0, 0], sizes = [8, 128], strides = [1, 1]} : vector<8x384xf32> to vector<8x128xf32>
    %166 = vector.extract_strided_slice %164 {offsets = [0, 0], sizes = [8, 128], strides = [1, 1]} : vector<8x384xf32> to vector<8x128xf32>
    %167 = arith.addf %165, %166 : vector<8x128xf32>
    %168 = arith.negf %167 : vector<8x128xf32>
    %169 = math.exp %168 : vector<8x128xf32>
    %cst_52 = arith.constant 1.000000e+00 : f32
    %170 = vector.broadcast %cst_52 : f32 to vector<8x128xf32>
    %171 = arith.addf %170, %169 : vector<8x128xf32>
    %172 = arith.divf %170, %171 : vector<8x128xf32>
    %173 = vector.extract_strided_slice %161 {offsets = [0, 128], sizes = [8, 128], strides = [1, 1]} : vector<8x384xf32> to vector<8x128xf32>
    %174 = vector.extract_strided_slice %164 {offsets = [0, 128], sizes = [8, 128], strides = [1, 1]} : vector<8x384xf32> to vector<8x128xf32>
    %175 = arith.addf %173, %174 : vector<8x128xf32>
    %176 = arith.negf %175 : vector<8x128xf32>
    %177 = math.exp %176 : vector<8x128xf32>
    %cst_53 = arith.constant 1.000000e+00 : f32
    %178 = vector.broadcast %cst_53 : f32 to vector<8x128xf32>
    %179 = arith.addf %178, %177 : vector<8x128xf32>
    %180 = arith.divf %178, %179 : vector<8x128xf32>
    %181 = vector.extract_strided_slice %161 {offsets = [0, 256], sizes = [8, 128], strides = [1, 1]} : vector<8x384xf32> to vector<8x128xf32>
    %182 = vector.extract_strided_slice %164 {offsets = [0, 256], sizes = [8, 128], strides = [1, 1]} : vector<8x384xf32> to vector<8x128xf32>
    %183 = arith.mulf %172, %182 : vector<8x128xf32>
    %184 = arith.addf %181, %183 : vector<8x128xf32>
    %185 = math.tanh %184 : vector<8x128xf32>
    %cst_54 = arith.constant 1.000000e+00 : f32
    %186 = vector.broadcast %cst_54 : f32 to vector<8x128xf32>
    %187 = arith.subf %186, %180 : vector<8x128xf32>
    %188 = arith.mulf %187, %185 : vector<8x128xf32>
    %189 = arith.mulf %180, %154 : vector<8x128xf32>
    %190 = arith.addf %188, %189 : vector<8x128xf32>
    %191 = arith.index_cast %c4_i32 : i32 to index
    %c0_55 = arith.constant 0 : index
    %c0_56 = arith.constant 0 : index
    %192 = vector.load %arg6[%191, %c0_55, %c0_56] : memref<8x8x128xf32, #tpu.memory_space<vmem>>, vector<1x8x128xf32>
    %193 = vector.shape_cast %192 : vector<1x8x128xf32> to vector<8x128xf32>
    %194 = vector.shape_cast %190 : vector<8x128xf32> to vector<1x8x128xf32>
    tpu.vector_store %arg6[%191, %c0_55, %c0_56], %194 {strides = array<i32>} : memref<8x8x128xf32, #tpu.memory_space<vmem>>, vector<1x8x128xf32>,
    %c5_i32 = arith.constant 5 : i32
    %195 = arith.index_cast %c5_i32 : i32 to index
    %c0_57 = arith.constant 0 : index
    %c0_58 = arith.constant 0 : index
    %196 = vector.load %arg8[%195, %c0_57, %c0_58] : memref<8x8x384xf32, #tpu.memory_space<vmem>>, vector<1x8x384xf32>
    %197 = vector.shape_cast %196 : vector<1x8x384xf32> to vector<8x384xf32>
    %cst_59 = arith.constant dense<0.000000e+00> : vector<8x384xf32>
    %198 = tpu.matmul %190, %12, %cst_59 {dimension_numbers = #tpu.dot_dimension_numbers<[1], [0], [0], [1], [0, 0, 1, 1], [], []>} : vector<8x128xf32>, vector<128x384xf32>, vector<8x384xf32> -> vector<8x384xf32>
    %199 = vector.broadcast %13 : vector<1x384xf32> to vector<8x384xf32>
    %200 = arith.addf %198, %199 : vector<8x384xf32>
    %201 = vector.extract_strided_slice %197 {offsets = [0, 0], sizes = [8, 128], strides = [1, 1]} : vector<8x384xf32> to vector<8x128xf32>
    %202 = vector.extract_strided_slice %200 {offsets = [0, 0], sizes = [8, 128], strides = [1, 1]} : vector<8x384xf32> to vector<8x128xf32>
    %203 = arith.addf %201, %202 : vector<8x128xf32>
    %204 = arith.negf %203 : vector<8x128xf32>
    %205 = math.exp %204 : vector<8x128xf32>
    %cst_60 = arith.constant 1.000000e+00 : f32
    %206 = vector.broadcast %cst_60 : f32 to vector<8x128xf32>
    %207 = arith.addf %206, %205 : vector<8x128xf32>
    %208 = arith.divf %206, %207 : vector<8x128xf32>
    %209 = vector.extract_strided_slice %197 {offsets = [0, 128], sizes = [8, 128], strides = [1, 1]} : vector<8x384xf32> to vector<8x128xf32>
    %210 = vector.extract_strided_slice %200 {offsets = [0, 128], sizes = [8, 128], strides = [1, 1]} : vector<8x384xf32> to vector<8x128xf32>
    %211 = arith.addf %209, %210 : vector<8x128xf32>
    %212 = arith.negf %211 : vector<8x128xf32>
    %213 = math.exp %212 : vector<8x128xf32>
    %cst_61 = arith.constant 1.000000e+00 : f32
    %214 = vector.broadcast %cst_61 : f32 to vector<8x128xf32>
    %215 = arith.addf %214, %213 : vector<8x128xf32>
    %216 = arith.divf %214, %215 : vector<8x128xf32>
    %217 = vector.extract_strided_slice %197 {offsets = [0, 256], sizes = [8, 128], strides = [1, 1]} : vector<8x384xf32> to vector<8x128xf32>
    %218 = vector.extract_strided_slice %200 {offsets = [0, 256], sizes = [8, 128], strides = [1, 1]} : vector<8x384xf32> to vector<8x128xf32>
    %219 = arith.mulf %208, %218 : vector<8x128xf32>
    %220 = arith.addf %217, %219 : vector<8x128xf32>
    %221 = math.tanh %220 : vector<8x128xf32>
    %cst_62 = arith.constant 1.000000e+00 : f32
    %222 = vector.broadcast %cst_62 : f32 to vector<8x128xf32>
    %223 = arith.subf %222, %216 : vector<8x128xf32>
    %224 = arith.mulf %223, %221 : vector<8x128xf32>
    %225 = arith.mulf %216, %190 : vector<8x128xf32>
    %226 = arith.addf %224, %225 : vector<8x128xf32>
    %227 = arith.index_cast %c5_i32 : i32 to index
    %c0_63 = arith.constant 0 : index
    %c0_64 = arith.constant 0 : index
    %228 = vector.load %arg6[%227, %c0_63, %c0_64] : memref<8x8x128xf32, #tpu.memory_space<vmem>>, vector<1x8x128xf32>
    %229 = vector.shape_cast %228 : vector<1x8x128xf32> to vector<8x128xf32>
    %230 = vector.shape_cast %226 : vector<8x128xf32> to vector<1x8x128xf32>
    tpu.vector_store %arg6[%227, %c0_63, %c0_64], %230 {strides = array<i32>} : memref<8x8x128xf32, #tpu.memory_space<vmem>>, vector<1x8x128xf32>,
    %c6_i32 = arith.constant 6 : i32
    %231 = arith.index_cast %c6_i32 : i32 to index
    %c0_65 = arith.constant 0 : index
    %c0_66 = arith.constant 0 : index
    %232 = vector.load %arg8[%231, %c0_65, %c0_66] : memref<8x8x384xf32, #tpu.memory_space<vmem>>, vector<1x8x384xf32>
    %233 = vector.shape_cast %232 : vector<1x8x384xf32> to vector<8x384xf32>
    %cst_67 = arith.constant dense<0.000000e+00> : vector<8x384xf32>
    %234 = tpu.matmul %226, %12, %cst_67 {dimension_numbers = #tpu.dot_dimension_numbers<[1], [0], [0], [1], [0, 0, 1, 1], [], []>} : vector<8x128xf32>, vector<128x384xf32>, vector<8x384xf32> -> vector<8x384xf32>
    %235 = vector.broadcast %13 : vector<1x384xf32> to vector<8x384xf32>
    %236 = arith.addf %234, %235 : vector<8x384xf32>
    %237 = vector.extract_strided_slice %233 {offsets = [0, 0], sizes = [8, 128], strides = [1, 1]} : vector<8x384xf32> to vector<8x128xf32>
    %238 = vector.extract_strided_slice %236 {offsets = [0, 0], sizes = [8, 128], strides = [1, 1]} : vector<8x384xf32> to vector<8x128xf32>
    %239 = arith.addf %237, %238 : vector<8x128xf32>
    %240 = arith.negf %239 : vector<8x128xf32>
    %241 = math.exp %240 : vector<8x128xf32>
    %cst_68 = arith.constant 1.000000e+00 : f32
    %242 = vector.broadcast %cst_68 : f32 to vector<8x128xf32>
    %243 = arith.addf %242, %241 : vector<8x128xf32>
    %244 = arith.divf %242, %243 : vector<8x128xf32>
    %245 = vector.extract_strided_slice %233 {offsets = [0, 128], sizes = [8, 128], strides = [1, 1]} : vector<8x384xf32> to vector<8x128xf32>
    %246 = vector.extract_strided_slice %236 {offsets = [0, 128], sizes = [8, 128], strides = [1, 1]} : vector<8x384xf32> to vector<8x128xf32>
    %247 = arith.addf %245, %246 : vector<8x128xf32>
    %248 = arith.negf %247 : vector<8x128xf32>
    %249 = math.exp %248 : vector<8x128xf32>
    %cst_69 = arith.constant 1.000000e+00 : f32
    %250 = vector.broadcast %cst_69 : f32 to vector<8x128xf32>
    %251 = arith.addf %250, %249 : vector<8x128xf32>
    %252 = arith.divf %250, %251 : vector<8x128xf32>
    %253 = vector.extract_strided_slice %233 {offsets = [0, 256], sizes = [8, 128], strides = [1, 1]} : vector<8x384xf32> to vector<8x128xf32>
    %254 = vector.extract_strided_slice %236 {offsets = [0, 256], sizes = [8, 128], strides = [1, 1]} : vector<8x384xf32> to vector<8x128xf32>
    %255 = arith.mulf %244, %254 : vector<8x128xf32>
    %256 = arith.addf %253, %255 : vector<8x128xf32>
    %257 = math.tanh %256 : vector<8x128xf32>
    %cst_70 = arith.constant 1.000000e+00 : f32
    %258 = vector.broadcast %cst_70 : f32 to vector<8x128xf32>
    %259 = arith.subf %258, %252 : vector<8x128xf32>
    %260 = arith.mulf %259, %257 : vector<8x128xf32>
    %261 = arith.mulf %252, %226 : vector<8x128xf32>
    %262 = arith.addf %260, %261 : vector<8x128xf32>
    %263 = arith.index_cast %c6_i32 : i32 to index
    %c0_71 = arith.constant 0 : index
    %c0_72 = arith.constant 0 : index
    %264 = vector.load %arg6[%263, %c0_71, %c0_72] : memref<8x8x128xf32, #tpu.memory_space<vmem>>, vector<1x8x128xf32>
    %265 = vector.shape_cast %264 : vector<1x8x128xf32> to vector<8x128xf32>
    %266 = vector.shape_cast %262 : vector<8x128xf32> to vector<1x8x128xf32>
    tpu.vector_store %arg6[%263, %c0_71, %c0_72], %266 {strides = array<i32>} : memref<8x8x128xf32, #tpu.memory_space<vmem>>, vector<1x8x128xf32>,
    %c7_i32 = arith.constant 7 : i32
    %267 = arith.index_cast %c7_i32 : i32 to index
    %c0_73 = arith.constant 0 : index
    %c0_74 = arith.constant 0 : index
    %268 = vector.load %arg8[%267, %c0_73, %c0_74] : memref<8x8x384xf32, #tpu.memory_space<vmem>>, vector<1x8x384xf32>
    %269 = vector.shape_cast %268 : vector<1x8x384xf32> to vector<8x384xf32>
    %cst_75 = arith.constant dense<0.000000e+00> : vector<8x384xf32>
    %270 = tpu.matmul %262, %12, %cst_75 {dimension_numbers = #tpu.dot_dimension_numbers<[1], [0], [0], [1], [0, 0, 1, 1], [], []>} : vector<8x128xf32>, vector<128x384xf32>, vector<8x384xf32> -> vector<8x384xf32>
    %271 = vector.broadcast %13 : vector<1x384xf32> to vector<8x384xf32>
    %272 = arith.addf %270, %271 : vector<8x384xf32>
    %273 = vector.extract_strided_slice %269 {offsets = [0, 0], sizes = [8, 128], strides = [1, 1]} : vector<8x384xf32> to vector<8x128xf32>
    %274 = vector.extract_strided_slice %272 {offsets = [0, 0], sizes = [8, 128], strides = [1, 1]} : vector<8x384xf32> to vector<8x128xf32>
    %275 = arith.addf %273, %274 : vector<8x128xf32>
    %276 = arith.negf %275 : vector<8x128xf32>
    %277 = math.exp %276 : vector<8x128xf32>
    %cst_76 = arith.constant 1.000000e+00 : f32
    %278 = vector.broadcast %cst_76 : f32 to vector<8x128xf32>
    %279 = arith.addf %278, %277 : vector<8x128xf32>
    %280 = arith.divf %278, %279 : vector<8x128xf32>
    %281 = vector.extract_strided_slice %269 {offsets = [0, 128], sizes = [8, 128], strides = [1, 1]} : vector<8x384xf32> to vector<8x128xf32>
    %282 = vector.extract_strided_slice %272 {offsets = [0, 128], sizes = [8, 128], strides = [1, 1]} : vector<8x384xf32> to vector<8x128xf32>
    %283 = arith.addf %281, %282 : vector<8x128xf32>
    %284 = arith.negf %283 : vector<8x128xf32>
    %285 = math.exp %284 : vector<8x128xf32>
    %cst_77 = arith.constant 1.000000e+00 : f32
    %286 = vector.broadcast %cst_77 : f32 to vector<8x128xf32>
    %287 = arith.addf %286, %285 : vector<8x128xf32>
    %288 = arith.divf %286, %287 : vector<8x128xf32>
    %289 = vector.extract_strided_slice %269 {offsets = [0, 256], sizes = [8, 128], strides = [1, 1]} : vector<8x384xf32> to vector<8x128xf32>
    %290 = vector.extract_strided_slice %272 {offsets = [0, 256], sizes = [8, 128], strides = [1, 1]} : vector<8x384xf32> to vector<8x128xf32>
    %291 = arith.mulf %280, %290 : vector<8x128xf32>
    %292 = arith.addf %289, %291 : vector<8x128xf32>
    %293 = math.tanh %292 : vector<8x128xf32>
    %cst_78 = arith.constant 1.000000e+00 : f32
    %294 = vector.broadcast %cst_78 : f32 to vector<8x128xf32>
    %295 = arith.subf %294, %288 : vector<8x128xf32>
    %296 = arith.mulf %295, %293 : vector<8x128xf32>
    %297 = arith.mulf %288, %262 : vector<8x128xf32>
    %298 = arith.addf %296, %297 : vector<8x128xf32>
    %299 = arith.index_cast %c7_i32 : i32 to index
    %c0_79 = arith.constant 0 : index
    %c0_80 = arith.constant 0 : index
    %300 = vector.load %arg6[%299, %c0_79, %c0_80] : memref<8x8x128xf32, #tpu.memory_space<vmem>>, vector<1x8x128xf32>
    %301 = vector.shape_cast %300 : vector<1x8x128xf32> to vector<8x128xf32>
    %302 = vector.shape_cast %298 : vector<8x128xf32> to vector<1x8x128xf32>
    tpu.vector_store %arg6[%299, %c0_79, %c0_80], %302 {strides = array<i32>} : memref<8x8x128xf32, #tpu.memory_space<vmem>>, vector<1x8x128xf32>,
    %c8_i32 = arith.constant 8 : i32
    %c0_81 = arith.constant 0 : index
    %c0_82 = arith.constant 0 : index
    %303 = vector.load %arg7[%c0_81, %c0_82] : memref<8x128xf32, #tpu.memory_space<vmem>>, vector<8x128xf32>
    tpu.vector_store %arg7[%c0_81, %c0_82], %298 {strides = array<i32>} : memref<8x128xf32, #tpu.memory_space<vmem>>, vector<8x128xf32>,
    return
  }
  func.func @transform_0(%arg0: i32) -> (i32, i32, i32) {
    %c0_i32 = arith.constant 0 : i32
    %c0_i32_0 = arith.constant 0 : i32
    %c0_i32_1 = arith.constant 0 : i32
    return %arg0, %c0_i32, %c0_i32_0 : i32, i32, i32
  }
  func.func @transform_1(%arg0: i32) -> (i32, i32) {
    %c0_i32 = arith.constant 0 : i32
    %c0_i32_0 = arith.constant 0 : i32
    %c0_i32_1 = arith.constant 0 : i32
    return %c0_i32, %c0_i32_0 : i32, i32
  }
  func.func @transform_2(%arg0: i32) -> (i32, i32) {
    %c0_i32 = arith.constant 0 : i32
    %c0_i32_0 = arith.constant 0 : i32
    %c0_i32_1 = arith.constant 0 : i32
    return %c0_i32, %c0_i32_0 : i32, i32
  }
  func.func @transform_3(%arg0: i32) -> (i32, i32) {
    %c0_i32 = arith.constant 0 : i32
    %c0_i32_0 = arith.constant 0 : i32
    %c0_i32_1 = arith.constant 0 : i32
    return %c0_i32, %c0_i32_0 : i32, i32
  }
  func.func @transform_4(%arg0: i32) -> (i32, i32) {
    %c0_i32 = arith.constant 0 : i32
    %c0_i32_0 = arith.constant 0 : i32
    %c0_i32_1 = arith.constant 0 : i32
    return %c0_i32, %c0_i32_0 : i32, i32
  }
  func.func @transform_5(%arg0: i32) -> (i32, i32, i32) {
    %c0_i32 = arith.constant 0 : i32
    %c0_i32_0 = arith.constant 0 : i32
    %c0_i32_1 = arith.constant 0 : i32
    return %arg0, %c0_i32, %c0_i32_0 : i32, i32, i32
  }
}

</mosaic_0001>

<bundles_post_ra>
// kernel: tpu_custom_call.1
= control target key start
LH: loop header
LB: loop body
LE: loop exit
PB: predicated region body
PF: predicated region fallthrough
CT: control target
= control target key end

     0   :  { %10 = vsyncpa [#allocation5], 0  ;;  %s3676_s0 = inlined_call_operand.hbm [shape: f32[8,8,128], index: 0, kind: input, shape index: {}]   ;;  %s3677_s1 = inlined_call_operand.hbm [shape: f32[128,384], index: 1, kind: input, shape index: {}]   ;;  %s3678_s2 = inlined_call_operand.hbm [shape: f32[128,384], index: 2, kind: input, shape index: {}]   ;;  %s3679_s3 = inlined_call_operand.hbm [shape: f32[1,384], index: 3, kind: input, shape index: {}]   ;;  %s3680_s4 = inlined_call_operand.hbm [shape: f32[1,384], index: 4, kind: input, shape index: {}]   ;;  %s3681_s5 = inlined_call_operand.hbm [shape: f32[8,8,128], index: 5, kind: output, shape index: {}]  }
   0x1   :  { %11 = vsyncpa [#allocation8], 0 }
   0x2   :  { %12 = vsyncpa [#allocation11], 0 }
   0x3   :  { %13 = vsyncpa [#allocation6], 0  ;;  %s3126_s18 = smov [#allocation7]   ;;  %s2986_s22 = scalar_lea.hbm %s3677_s1, 6144 }
   0x4   :  { %s31_s19 = sshll.u32 %s3126_s18, 4  ;;  %p2987_p0 = scmp.ne.s32.totalorder %s3677_s1, %s2986_s22  ;;  %s32_s19 = int_to_ptr.vmem [resolvable:$true] %s31_s19 }
   0x5   :  { %p2990_p1 = scmp.lt.u32.totalorder %s2986_s22, %s3677_s1 }
   0x7   :  { %p2992_p2 = pnand %p2990_p1, %p2987_p0 }
   0x9   :  { %2995 = shalt.err (!%p2992_p2)
}
   0xa   :  { %s2996_s27 = scalar_lea.vmem %s32_s19, 6144  ;;  %p3001_p4 = scmp.lt.s32.totalorder %s32_s19, %s32_s19 }
   0xb   :  { %p2997_p3 = scmp.ne.s32.totalorder %s32_s19, %s2996_s27  ;;  %p3002_p5 = scmp.lt.s32.totalorder %s2996_s27, %s2996_s27 }
   0xd   :  { %p3003_p6 = por %p3002_p5, %p3001_p4 }
   0xf   :  { %p3004_p7 = pnand %p3003_p6, %p2997_p3 }
  0x11   :  { %3007 = shalt.err (!%p3004_p7)
}
  0x12   :  { %s3127_s28 = smov 384   ;;  %s3128_s29 = smov 24  }
  0x13   :  { %37 = dma.hbm_to_vmem [thread:$0]  %s3677_s1, 6144, %s32_s19, [#allocation8], %s3127_s28, %s3127_s28, %s3128_s29  }
  0x14   :  { %s3129_s7 = smov [#allocation10]   ;;  %s3130_s9 = smov [#allocation4]  }
  0x15   :  { %s56_s8 = sshll.u32 %s3129_s7, 4  ;;  %s19_s10 = sshll.u32 %s3130_s9, 4  ;;  %s57_s8 = int_to_ptr.vmem [resolvable:$true] %s56_s8  ;;  %s20_s10 = int_to_ptr.vmem [resolvable:$true] %s19_s10 }
  0x16   :  { %s3008_s13 = scalar_lea.hbm %s3679_s3, 48 }
  0x17   :  { %p3009_p8 = scmp.ne.s32.totalorder %s3679_s3, %s3008_s13  ;;  %p3012_p9 = scmp.lt.u32.totalorder %s3008_s13, %s3679_s3 }
  0x19   :  { %p3014_p10 = pnand %p3012_p9, %p3009_p8 }
  0x1b   :  { %3017 = shalt.err (!%p3014_p10)
}
  0x1c   :  { %s3018_s1 = scalar_lea.vmem %s57_s8, 48  ;;  %s3022_s18 = scalar_lea.vmem %s57_s8, 64 }
  0x1d   :  { %p3019_p11 = scmp.ne.s32.totalorder %s57_s8, %s3018_s1  ;;  %p3023_p12 = scmp.lt.s32.totalorder %s57_s8, %s57_s8 }
  0x1e   :  { %p3024_p13 = scmp.lt.s32.totalorder %s3022_s18, %s3018_s1 }
  0x20   :  { %p3025_p0 = por %p3024_p13, %p3023_p12 }
  0x22   :  { %p3026_p1 = pnand %p3025_p0, %p3019_p11 }
  0x24   :  { %3029 = shalt.err (!%p3026_p1)
}
  0x25   :  { %59 = dma.hbm_to_vmem [thread:$0]  %s3679_s3, 48, %s57_s8, [#allocation11]  }
  0x26   :  { %s3030_s23 = scalar_lea.hbm %s3676_s0, 1024 }
  0x27   :  { %p3031_p2 = scmp.ne.s32.totalorder %s3676_s0, %s3030_s23  ;;  %p3034_p3 = scmp.lt.u32.totalorder %s3030_s23, %s3676_s0 }
  0x29   :  { %p3036_p4 = pnand %p3034_p3, %p3031_p2 }
  0x2b   :  { %3039 = shalt.err (!%p3036_p4)
}
  0x2c   :  { %s3040_s30 = scalar_lea.vmem %s20_s10, 1024  ;;  %p3045_p6 = scmp.lt.s32.totalorder %s20_s10, %s20_s10 }
  0x2d   :  { %p3041_p5 = scmp.ne.s32.totalorder %s20_s10, %s3040_s30  ;;  %p3046_p7 = scmp.lt.s32.totalorder %s3040_s30, %s3040_s30 }
  0x2f   :  { %p3047_p8 = por %p3046_p7, %p3045_p6 }
  0x31   :  { %p3048_p9 = pnand %p3047_p8, %p3041_p5 }
  0x33   :  { %3051 = shalt.err (!%p3048_p9)
}
  0x34   :  { %s3131_s3 = smov 128   ;;  %s3132_s6 = smov 8  }
  0x35   :  { %25 = dma.hbm_to_vmem [thread:$0]  %s3676_s0, 1024, %s20_s10, [#allocation5], %s3131_s3, %s3131_s3, %s3132_s6  }
  0x36   :  { %s3133_s9 = smov [#allocation9]   ;;  %s3134_s12 = smov [#allocation12]  }
  0x37   :  { %s43_s11 = sshll.u32 %s3133_s9, 4  ;;  %s66_s13 = sshll.u32 %s3134_s12, 4  ;;  %s44_s11 = int_to_ptr.vmem [resolvable:$true] %s43_s11  ;;  %s67_s13 = int_to_ptr.vmem [resolvable:$true] %s66_s13 }
  0x38   :  { %s3052_s16 = scalar_lea.hbm %s3678_s2, 6144 }
  0x39   :  { %p3053_p10 = scmp.ne.s32.totalorder %s3678_s2, %s3052_s16  ;;  %p3056_p11 = scmp.lt.u32.totalorder %s3052_s16, %s3678_s2 }
  0x3b   :  { %p3058_p12 = pnand %p3056_p11, %p3053_p10 }
  0x3d   :  { %3061 = shalt.err (!%p3058_p12)
}
  0x3e   :  { %s3062_s0 = scalar_lea.vmem %s44_s11, 6144  ;;  %p3067_p0 = scmp.lt.s32.totalorder %s44_s11, %s44_s11 }
  0x3f   :  { %p3063_p13 = scmp.ne.s32.totalorder %s44_s11, %s3062_s0  ;;  %p3068_p1 = scmp.lt.s32.totalorder %s3062_s0, %s3062_s0 }
  0x41   :  { %p3069_p2 = por %p3068_p1, %p3067_p0 }
  0x43   :  { %p3070_p3 = pnand %p3069_p2, %p3063_p13 }
  0x45   :  { %3073 = shalt.err (!%p3070_p3)
}
  0x46   :  { %49 = dma.hbm_to_vmem [thread:$0]  %s3678_s2, 6144, %s44_s11, [#allocation8], %s3127_s28, %s3127_s28, %s3128_s29  }
  0x47   :  { %s3074_s23 = scalar_lea.hbm %s3680_s4, 48 }
  0x48   :  { %p3075_p4 = scmp.ne.s32.totalorder %s3680_s4, %s3074_s23  ;;  %p3078_p5 = scmp.lt.u32.totalorder %s3074_s23, %s3680_s4 }
  0x4a   :  { %p3080_p6 = pnand %p3078_p5, %p3075_p4 }
  0x4c   :  { %3083 = shalt.err (!%p3080_p6)
}
  0x4d   :  { %s3084_s30 = scalar_lea.vmem %s67_s13, 48  ;;  %s3088_s7 = scalar_lea.vmem %s67_s13, 64 }
  0x4e   :  { %p3085_p7 = scmp.ne.s32.totalorder %s67_s13, %s3084_s30  ;;  %p3089_p8 = scmp.lt.s32.totalorder %s67_s13, %s67_s13 }
  0x4f   :  { %p3090_p9 = scmp.lt.s32.totalorder %s3088_s7, %s3084_s30 }
  0x51   :  { %p3091_p10 = por %p3090_p9, %p3089_p8 }
  0x53   :  { %p3092_p11 = pnand %p3091_p10, %p3085_p7 }
  0x55   :  { %3095 = shalt.err (!%p3092_p11)
}
  0x56   :  { %69 = dma.hbm_to_vmem [thread:$0]  %s3680_s4, 48, %s67_s13, [#allocation11]  }
  0x57   :  { %3118 = dma.done.wait [#allocation5], 1024  }
  0x58   :  { %3119 = vsyncadd [#allocation5], 4294966272 }
  0x59   :  { %3120 = dma.done.wait [#allocation8], 12288  }
  0x5a   :  { %3121 = vsyncadd [#allocation8], 4294955008 }
  0x5b   :  { %3122 = dma.done.wait [#allocation11], 96  }
  0x5c   :  { %3123 = vsyncadd [#allocation11], 4294967200  ;;  %v3135_v0 = vmov 0.0   ;;  %v99_v1 = vld [vmem:[#allocation7 + $0x8] sm:$0xff]  ;;  %v102_v2 = vld [vmem:[#allocation7 + $0x20] sm:$0xff]  ;;  %vm3137_vm0 = vmmov 0  }
  0x5d   :  { %227 = vmatprep.mubr.f32.mxu0 %v3135_v0  ;;  %v98_v3 = vld [vmem:[#allocation7] sm:$0xff]  ;;  %v2333_v4 = vpack.c.bf16 %v102_v2, %v99_v1  ;;  %v101_v5 = vld [vmem:[#allocation7 + $0x18] sm:$0xff]  ;;  %v108_v7 = vld [vmem:[#allocation7 + $0x50] sm:$0xff]  ;;  %s3138_s4 = smov [#allocation13]  }
  0x5e   :  { %v105_v6 = vld [vmem:[#allocation7 + $0x38] sm:$0xff]  ;;  %v2335_v8 = vpack.c.bf16 %v101_v5, %v98_v3  ;;  %v104_v10 = vld [vmem:[#allocation7 + $0x30] sm:$0xff]  ;;  %v107_v11 = vld [vmem:[#allocation7 + $0x48] sm:$0xff]  ;;  %s1819_s29 = sshll.u32 %s3138_s4, 4  ;;  %s1820_s29 = int_to_ptr.vmem [resolvable:$true] %s1819_s29 }
  0x5f   :  { %v2337_v9 = vpack.c.bf16 %v108_v7, %v105_v6  ;;  %v111_v12 = vld [vmem:[#allocation7 + $0x68] sm:$0xff]  ;;  %2334 = vmatprep.subr.bf16.mxu0 %v2333_v4  ;;  %v114_v13 = vld [vmem:[#allocation7 + $0x80] sm:$0xff]  ;;  %v2339_v14 = vpack.c.bf16 %v107_v11, %v104_v10  ;;  %v113_v17 = vld [vmem:[#allocation7 + $0x78] sm:$0xff]  ;;  %s3096_s8 = scalar_lea.vmem %s1820_s29, 1024  ;;  %p3101_p13 = scmp.lt.s32.totalorder %s1820_s29, %s1820_s29 }
  0x60   :  { %2336 = vmatpush1.bf16.msra.mxu0 %v2335_v8  ;;  %v2341_v15 = vpack.c.bf16 %v114_v13, %v111_v12  ;;  %v110_v16 = vld [vmem:[#allocation7 + $0x60] sm:$0xff]  ;;  %v117_v18 = vld [vmem:[#allocation7 + $0x98] sm:$0xff]  ;;  %v120_v19 = vld [vmem:[#allocation7 + $0xb0] sm:$0xff]  ;;  %p3097_p12 = scmp.ne.s32.totalorder %s1820_s29, %s3096_s8  ;;  %p3102_p0 = scmp.lt.s32.totalorder %s3096_s8, %s3096_s8 }
  0x61   :  { %2338 = vmatprep.subr.bf16.mxu0 %v2337_v9  ;;  %v2343_v20 = vpack.c.bf16 %v113_v17, %v110_v16  ;;  %v116_v21 = vld [vmem:[#allocation7 + $0x90] sm:$0xff]  ;;  %v2345_v22 = vpack.c.bf16 %v120_v19, %v117_v18  ;;  %v119_v23 = vld [vmem:[#allocation7 + $0xa8] sm:$0xff]  ;;  %v126_v27 = vld [vmem:[#allocation7 + $0xe0] sm:$0xff] }
  0x62   :  { %v100_v24 = vld [vmem:[#allocation7 + $0x10] sm:$0xff]  ;;  %v103_v25 = vld [vmem:[#allocation7 + $0x28] sm:$0xff]  ;;  %v106_v29 = vld [vmem:[#allocation7 + $0x40] sm:$0xff]  ;;  %v2347_v31 = vpack.c.bf16 %v119_v23, %v116_v21  ;;  %p3103_p1 = por %p3102_p0, %p3101_p13 }
  0x63   :  { %v123_v26 = vld [vmem:[#allocation7 + $0xc8] sm:$0xff]  ;;  %v2365_v28 = vpack.c.bf16 %v103_v25, %v100_v24  ;;  %v109_v30 = vld [vmem:[#allocation7 + $0x58] sm:$0xff]  ;;  %v122_v32 = vld [vmem:[#allocation7 + $0xc0] sm:$0xff] }
  0x64   :  { %2340 = vmatpush1.bf16.msra.mxu0 %v2339_v14  ;;  %v2369_v33 = vpack.c.bf16 %v109_v30, %v106_v29  ;;  %v2349_v34 = vpack.c.bf16 %v126_v27, %v123_v26  ;;  %v125_v35 = vld [vmem:[#allocation7 + $0xd8] sm:$0xff]  ;;  %v3239_v36 = vld [vmem:[#allocation4] sm:$0xff]  ;;  %v112_v37 = vld [vmem:[#allocation7 + $0x70] sm:$0xff]  ;;  %p3104_p2 = pnand %p3103_p1, %p3097_p12 }
  0x65   :  { %2342 = vmatprep.subr.bf16.mxu0 %v2341_v15  ;;  %2366 = vmatprep.subr.bf16.mxu1 %v2365_v28  ;;  %v129_v38 = vld [vmem:[#allocation7 + $0xf8] sm:$0xff]  ;;  %v132_v39 = vld [vmem:[#allocation7 + $0x110] sm:$0xff]  ;;  %v115_v40 = vld [vmem:[#allocation7 + $0x88] sm:$0xff]  ;;  %v2351_v42 = vpack.c.bf16 %v125_v35, %v122_v32 }
  0x66   :  { %2368 = vmatpush3.bf16.msra.mxu1 %v2365_v28  ;;  %2041 = vmatprep.mubr.f32.mxu1 %v3239_v36  ;;  %v2373_v41 = vpack.c.bf16 %v115_v40, %v112_v37  ;;  %v118_v43 = vld [vmem:[#allocation7 + $0xa0] sm:$0xff]  ;;  %v121_v44 = vld [vmem:[#allocation7 + $0xb8] sm:$0xff]  ;;  %v2353_v45 = vpack.c.bf16 %v132_v39, %v129_v38  ;;  %v128_v46 = vld [vmem:[#allocation7 + $0xf0] sm:$0xff]  ;;  %v3136_v40 = vmov 0.0|0.0  }
  0x67   :  { %2370 = vmatprep.subr.bf16.mxu1 %v2369_v33  ;;  %v131_v47 = vld [vmem:[#allocation7 + $0x108] sm:$0xff]  ;;  %v138_v49 = vld [vmem:[#allocation7 + $0x140] sm:$0xff]  ;;  %v2377_v50 = vpack.c.bf16 %v121_v44, %v118_v43  ;;  %v124_v51 = vld [vmem:[#allocation7 + $0xd0] sm:$0xff] }
  0x68   :  { %2344 = vmatpush1.bf16.msra.mxu0 %v2343_v20  ;;  %v135_v48 = vld [vmem:[#allocation7 + $0x128] sm:$0xff]  ;;  %v2355_v53 = vpack.c.bf16 %v131_v47, %v128_v46  ;;  %v134_v55 = vld [vmem:[#allocation7 + $0x120] sm:$0xff]  ;;  %v137_v56 = vld [vmem:[#allocation7 + $0x138] sm:$0xff] }
  0x69   :  { %2346 = vmatprep.subr.bf16.mxu0 %v2345_v22  ;;  %v127_v52 = vld [vmem:[#allocation7 + $0xe8] sm:$0xff]  ;;  %v2357_v54 = vpack.c.bf16 %v138_v49, %v135_v48  ;;  %v141_v57 = vld [vmem:[#allocation7 + $0x158] sm:$0xff]  ;;  %v144_v58 = vld [vmem:[#allocation7 + $0x170] sm:$0xff]  ;;  %v2359_v62 = vpack.c.bf16 %v137_v56, %v134_v55 }
  0x6a   :  { %2372 = vmatpush3.bf16.msra.mxu1 %v2369_v33  ;;  %v2381_v59 = vpack.c.bf16 %v127_v52, %v124_v51  ;;  %v130_v60 = vld [vmem:[#allocation7 + $0x100] sm:$0xff]  ;;  %v133_v61 = vld [vmem:[#allocation7 + $0x118] sm:$0xff]  ;;  %v2361_v63 = vpack.c.bf16 %v144_v58, %v141_v57  ;;  %v140_v1 = vld [vmem:[#allocation7 + $0x150] sm:$0xff] }
  0x6b   :  { %2374 = vmatprep.subr.bf16.mxu1 %v2373_v41  ;;  %v143_v2 = vld [vmem:[#allocation7 + $0x168] sm:$0xff]  ;;  %v409_v4 = vld [vmem:[#allocation9 + $0x20] sm:$0xff]  ;;  %v2385_v5 = vpack.c.bf16 %v133_v61, %v130_v60  ;;  %v136_v6 = vld [vmem:[#allocation7 + $0x130] sm:$0xff] }
  0x6c   :  { %2348 = vmatpush1.bf16.msra.mxu0 %v2347_v31  ;;  %v406_v3 = vld [vmem:[#allocation9 + $0x8] sm:$0xff]  ;;  %v2363_v8 = vpack.c.bf16 %v143_v2, %v140_v1  ;;  %v405_v10 = vld [vmem:[#allocation9] sm:$0xff]  ;;  %v408_v11 = vld [vmem:[#allocation9 + $0x18] sm:$0xff] }
  0x6d   :  { %2350 = vmatprep.subr.bf16.mxu0 %v2349_v34  ;;  %v139_v7 = vld [vmem:[#allocation7 + $0x148] sm:$0xff]  ;;  %v3242_v9 = vpack.c.bf16 %v409_v4, %v406_v3  ;;  %v412_v12 = vld [vmem:[#allocation9 + $0x38] sm:$0xff]  ;;  %v415_v13 = vld [vmem:[#allocation9 + $0x50] sm:$0xff]  ;;  %v3244_v17 = vpack.c.bf16 %v408_v11, %v405_v10 }
  0x6e   :  { %2376 = vmatpush3.bf16.msra.mxu1 %v2373_v41  ;;  %v2389_v14 = vpack.c.bf16 %v139_v7, %v136_v6  ;;  %v142_v15 = vld [vmem:[#allocation7 + $0x160] sm:$0xff]  ;;  %v145_v16 = vld [vmem:[#allocation7 + $0x178] sm:$0xff]  ;;  %v3247_v18 = vpack.c.bf16 %v415_v13, %v412_v12  ;;  %v411_v19 = vld [vmem:[#allocation9 + $0x30] sm:$0xff] }
  0x6f   :  { %2378 = vmatprep.subr.bf16.mxu1 %v2377_v50  ;;  %v414_v20 = vld [vmem:[#allocation9 + $0x48] sm:$0xff]  ;;  %v421_v22 = vld [vmem:[#allocation9 + $0x80] sm:$0xff]  ;;  %v2393_v23 = vpack.c.bf16 %v145_v16, %v142_v15  ;;  %v420_v28 = vld [vmem:[#allocation9 + $0x78] sm:$0xff] }
  0x70   :  { %2352 = vmatpush1.bf16.msra.mxu0 %v2351_v42  ;;  %v418_v21 = vld [vmem:[#allocation9 + $0x68] sm:$0xff]  ;;  %v3252_v25 = vpack.c.bf16 %v414_v20, %v411_v19  ;;  %v417_v27 = vld [vmem:[#allocation9 + $0x60] sm:$0xff]  ;;  %v424_v29 = vld [vmem:[#allocation9 + $0x98] sm:$0xff] }
  0x71   :  { %2354 = vmatprep.subr.bf16.mxu0 %v2353_v45  ;;  %v91_v24 = vld [vmem:[#allocation4 + $0x8] sm:$0xff]  ;;  %v3255_v26 = vpack.c.bf16 %v421_v22, %v418_v21  ;;  %v427_v30 = vld [vmem:[#allocation9 + $0xb0] sm:$0xff]  ;;  %v3259_v34 = vpack.c.bf16 %v420_v28, %v417_v27  ;;  %v433_v39 = vld [vmem:[#allocation9 + $0xe0] sm:$0xff] }
  0x72   :  { %2380 = vmatpush3.bf16.msra.mxu1 %v2377_v50  ;;  %v407_v31 = vld [vmem:[#allocation9 + $0x10] sm:$0xff]  ;;  %v410_v32 = vld [vmem:[#allocation9 + $0x28] sm:$0xff]  ;;  %v3262_v35 = vpack.c.bf16 %v427_v30, %v424_v29  ;;  %v413_v42 = vld [vmem:[#allocation9 + $0x40] sm:$0xff] }
  0x73   :  { %2382 = vmatprep.subr.bf16.mxu1 %v2381_v59  ;;  %v92_v33 = vld [vmem:[#allocation4 + $0x10] sm:$0xff]  ;;  %v426_v37 = vld [vmem:[#allocation9 + $0xa8] sm:$0xff]  ;;  %v3265_v41 = vpack.c.bf16 %v410_v32, %v407_v31  ;;  %v416_v43 = vld [vmem:[#allocation9 + $0x58] sm:$0xff] }
  0x74   :  { %2356 = vmatpush1.bf16.msra.mxu0 %v2355_v53  ;;  %v430_v38 = vld [vmem:[#allocation9 + $0xc8] sm:$0xff]  ;;  %v93_v44 = vld [vmem:[#allocation4 + $0x18] sm:$0xff]  ;;  %v429_v47 = vld [vmem:[#allocation9 + $0xc0] sm:$0xff]  ;;  %v3275_v51 = vpack.c.bf16 %v416_v43, %v413_v42 }
  0x75   :  { %2358 = vmatprep.subr.bf16.mxu0 %v2357_v54  ;;  %v3272_v46 = vpack.c.bf16 %v433_v39, %v430_v38  ;;  %v432_v48 = vld [vmem:[#allocation9 + $0xd8] sm:$0xff]  ;;  %v439_v50 = vld [vmem:[#allocation9 + $0x110] sm:$0xff]  ;;  %v422_v53 = vld [vmem:[#allocation9 + $0x88] sm:$0xff] }
  0x76   :  { %2384 = vmatpush3.bf16.msra.mxu1 %v2381_v59  ;;  %v436_v49 = vld [vmem:[#allocation9 + $0xf8] sm:$0xff]  ;;  %v419_v52 = vld [vmem:[#allocation9 + $0x70] sm:$0xff]  ;;  %v94_v54 = vld [vmem:[#allocation4 + $0x20] sm:$0xff]  ;;  %v3280_v55 = vpack.c.bf16 %v432_v48, %v429_v47 }
  0x77   :  { %2386 = vmatprep.subr.bf16.mxu1 %v2385_v5  ;;  %v3283_v56 = vpack.c.bf16 %v439_v50, %v436_v49  ;;  %v435_v57 = vld [vmem:[#allocation9 + $0xf0] sm:$0xff]  ;;  %v438_v58 = vld [vmem:[#allocation9 + $0x108] sm:$0xff]  ;;  %v445_v60 = vld [vmem:[#allocation9 + $0x140] sm:$0xff]  ;;  %v3286_v61 = vpack.c.bf16 %v422_v53, %v419_v52 }
  0x78   :  { %2360 = vmatpush1.bf16.msra.mxu0 %v2359_v62  ;;  %v442_v59 = vld [vmem:[#allocation9 + $0x128] sm:$0xff]  ;;  %v425_v62 = vld [vmem:[#allocation9 + $0xa0] sm:$0xff]  ;;  %v3291_v2 = vpack.c.bf16 %v438_v58, %v435_v57  ;;  %v96_v3 = vld [vmem:[#allocation4 + $0x30] sm:$0xff] }
  0x79   :  { %2362 = vmatprep.subr.bf16.mxu0 %v2361_v63  ;;  %v428_v63 = vld [vmem:[#allocation9 + $0xb8] sm:$0xff]  ;;  %v95_v1 = vld [vmem:[#allocation4 + $0x28] sm:$0xff]  ;;  %v3294_v4 = vpack.c.bf16 %v445_v60, %v442_v59  ;;  %v431_v11 = vld [vmem:[#allocation9 + $0xd0] sm:$0xff] }
  0x7a   :  { %2388 = vmatpush3.bf16.msra.mxu1 %v2385_v5  ;;  %v441_v5 = vld [vmem:[#allocation9 + $0x120] sm:$0xff]  ;;  %v444_v6 = vld [vmem:[#allocation9 + $0x138] sm:$0xff]  ;;  %v3297_v10 = vpack.c.bf16 %v428_v63, %v425_v62  ;;  %v434_v12 = vld [vmem:[#allocation9 + $0xe8] sm:$0xff] }
  0x7b   :  { %2390 = vmatprep.subr.bf16.mxu1 %v2389_v14  ;;  %v448_v7 = vld [vmem:[#allocation9 + $0x158] sm:$0xff]  ;;  %v3302_v13 = vpack.c.bf16 %v444_v6, %v441_v5  ;;  %v447_v16 = vld [vmem:[#allocation9 + $0x150] sm:$0xff]  ;;  %v450_v19 = vld [vmem:[#allocation9 + $0x168] sm:$0xff]  ;;  %v3308_v20 = vpack.c.bf16 %v434_v12, %v431_v11 }
  0x7c   :  { %2364 = vmatpush1.bf16.msra.mxu0 %v2363_v8  ;;  %v451_v8 = vld [vmem:[#allocation9 + $0x170] sm:$0xff]  ;;  %v437_v21 = vld [vmem:[#allocation9 + $0x100] sm:$0xff]  ;;  %v440_v22 = vld [vmem:[#allocation9 + $0x118] sm:$0xff] }
  0x7d   :  { %2398 = vmatprep.subr.bf16.mxu0 %v3242_v9  ;;  %v3305_v15 = vpack.c.bf16 %v451_v8, %v448_v7  ;;  %v443_v27 = vld [vmem:[#allocation9 + $0x130] sm:$0xff]  ;;  %v446_v28 = vld [vmem:[#allocation9 + $0x148] sm:$0xff]  ;;  %v449_v30 = vld [vmem:[#allocation9 + $0x160] sm:$0xff] }
  0x7e   :  { %2392 = vmatpush3.bf16.msra.mxu1 %v2389_v14  ;;  %v97_v14 = vld [vmem:[#allocation4 + $0x38] sm:$0xff]  ;;  %v3326_v29 = vpack.c.bf16 %v446_v28, %v443_v27  ;;  %v146_v38 = vld [vmem:[#allocation10] sm:$0x7]  ;;  %v453_v59 = vld [vmem:[#allocation12] sm:$0x7] }
  0x7f   :  { %228 = vmatmul.mubr.f32.vlgmr.msra.gmra.mrb[0].mxu0 %v3239_v36  ;;  %2394 = vmatprep.subr.bf16.mxu1 %v2393_v23  ;;  %v423_v36 = vld [vmem:[#allocation9 + $0x90] sm:$0xff]  ;;  %v452_v31 = vld [vmem:[#allocation9 + $0x178] sm:$0xff] }
  0x80   :  { %2400 = vmatpush1.bf16.msra.mxu0 %v3244_v17  ;;  %233 = vmatprep.mubr.f32.mxu0 %v3135_v0  ;;  %v3269_v45 = vpack.c.bf16 %v426_v37, %v423_v36  ;;  %v3334_v32 = vpack.c.bf16 %v452_v31, %v449_v30 }
  0x81   :  { %2402 = vmatprep.subr.bf16.mxu0 %v3247_v18 }
  0x82   :  { %2396 = vmatpush3.bf16.msra.mxu1 %v2393_v23  ;;  %v3315_v23 = vpack.c.bf16 %v450_v19, %v447_v16 }
  0x83   :  { %234 = vmatmul.mubr.f32.gmra.mrb[2].mxu0 %v91_v24  ;;  %2429 = vmatprep.subr.bf16.mxu1 %v3136_v40 }
  0x84   :  { %2404 = vmatpush1.bf16.msra.mxu0 %v3252_v25  ;;  %239 = vmatprep.mubr.f32.mxu0 %v3135_v0 }
  0x85   :  { %2406 = vmatprep.subr.bf16.mxu0 %v3255_v26  ;;  %2042 = vmatmul.mubr.f32.vlgmr.msra.gmra.mrb[0].mxu1 %v91_v24  ;;  %v3319_v24 = vpack.c.bf16 %v440_v22, %v437_v21 }
  0x86   :  { %2431 = vmatpush3.bf16.msra.mxu1 %v3265_v41  ;;  %2044 = vmatprep.mubr.f32.mxu1 %v92_v33 }
  0x87   :  { %240 = vmatmul.mubr.f32.gmra.mrb[4].mxu0 %v92_v33  ;;  %2432 = vmatprep.subr.bf16.mxu1 %v3136_v40  ;;  %v148_v33 = vlaneseq }
  0x88   :  { %2408 = vmatpush1.bf16.msra.mxu0 %v3259_v34  ;;  %245 = vmatprep.mubr.f32.mxu0 %v3135_v0 }
  0x89   :  { %2410 = vmatprep.subr.bf16.mxu0 %v3262_v35  ;;  %2045 = vmatmul.mubr.f32.gmra.mrb[2].mxu1 %v93_v44  ;;  %v149_v36 = vshrl.u32 %v148_v33, 7 }
  0x8a   :  { %2434 = vmatpush3.bf16.msra.mxu1 %v3275_v51  ;;  %2047 = vmatprep.mubr.f32.mxu1 %v94_v54 }
  0x8b   :  { %246 = vmatmul.mubr.f32.gmra.mrb[6].mxu0 %v93_v44  ;;  %2435 = vmatprep.subr.bf16.mxu1 %v3136_v40  ;;  %v158_v37 = vsub.s32 2, %v149_v36  ;;  %v150_v58 = vsub.s32 0, %v149_v36 }
  0x8c   :  { %2412 = vmatpush1.bf16.msra.mxu0 %v3269_v45  ;;  %251 = vmatprep.mubr.f32.mxu0 %v3135_v0 }
  0x8d   :  { %2414 = vmatprep.subr.bf16.mxu0 %v3272_v46  ;;  %2048 = vmatmul.mubr.f32.gmra.mrb[4].mxu1 %v95_v1  ;;  %v159_v39 = vrot.slane %v146_v38, %v158_v37  ;;  %v151_v5 = vrot.slane %v146_v38, %v150_v58  ;;  %v462_v6 = vrot.slane %v453_v59, %v150_v58 }
  0x8e   :  { %2437 = vmatpush3.bf16.msra.mxu1 %v3286_v61  ;;  %2050 = vmatprep.mubr.f32.mxu1 %v96_v3 }
  0x8f   :  { %252 = vmatmul.mubr.f32.gmra.mrb[8].mxu0 %v94_v54  ;;  %2438 = vmatprep.subr.bf16.mxu1 %v3136_v40  ;;  %v3386_v11 = vadd.f32 %v462_v6, %v151_v5 }
  0x90   :  { %2416 = vmatpush1.bf16.msra.mxu0 %v3280_v55  ;;  %257 = vmatprep.mubr.f32.mxu0 %v3135_v0 }
  0x91   :  { %2418 = vmatprep.subr.bf16.mxu0 %v3283_v56  ;;  %2051 = vmatmul.mubr.f32.gmra.mrb[6].mxu1 %v97_v14 }
  0x92   :  { %2440 = vmatpush3.bf16.msra.mxu1 %v3297_v10  ;;  %2085 = vmatprep.mubr.msk.f32.mxu1 %vm3137_vm0, %v3135_v0 }
  0x93   :  { %258 = vmatmul.mubr.f32.gmra.mrb[10].mxu0 %v95_v1  ;;  %2441 = vmatprep.subr.bf16.mxu1 %v3136_v40  ;;  %v154_v1 = vsub.s32 1, %v149_v36  ;;  %v3392_v36 = vrot.slane %v453_v59, %v158_v37 }
  0x94   :  { %2420 = vmatpush1.bf16.msra.mxu0 %v3291_v2  ;;  %263 = vmatprep.mubr.f32.mxu0 %v3135_v0 }
  0x95   :  { %2422 = vmatprep.subr.bf16.mxu0 %v3294_v4  ;;  %v155_v7 = vrot.slane %v146_v38, %v154_v1  ;;  %v466_v8 = vrot.slane %v453_v59, %v154_v1 }
  0x96   :  { %2443 = vmatpush3.bf16.msra.mxu1 %v3308_v20 }
  0x97   :  { %264 = vmatmul.mubr.f32.gmra.mrb[12].mxu0 %v96_v3  ;;  %2444 = vmatprep.subr.bf16.mxu1 %v3136_v40 }
  0x98   :  { %2424 = vmatpush1.bf16.msra.mxu0 %v3302_v13  ;;  %269 = vmatprep.mubr.f32.mxu0 %v3135_v0 }
  0x99   :  { %2426 = vmatprep.subr.bf16.mxu0 %v3305_v15 }
  0x9a   :  { %2446 = vmatpush3.bf16.msra.mxu1 %v3319_v24 }
  0x9b   :  { %270 = vmatmul.mubr.f32.gmra.mrb[14].mxu0 %v97_v14  ;;  %2447 = vmatprep.subr.bf16.mxu1 %v3136_v40  ;;  %v3388_v14 = vadd.f32 %v466_v8, %v155_v7 }
  0x9c   :  { %2428 = vmatpush1.bf16.msra.mxu0 %v3315_v23  ;;  %538 = vmatprep.mubr.f32.mxu0 %v3135_v0 }
  0x9d   :  { %2454 = vmatprep.subr.bf16.mxu0 %v3242_v9 }
  0x9e   :  { %2449 = vmatpush3.bf16.msra.mxu1 %v3326_v29 }
  0x9f   :  { %539 = vmatmul.mubr.f32.vlgmr.msra.gmra.mrb[0].mxu0 %v3135_v0  ;;  %2450 = vmatprep.subr.bf16.mxu1 %v3136_v40 }
  0xa0   :  { %2456 = vmatpush1.bf16.msra.mxu0 %v3244_v17  ;;  %705 = vmatprep.mubr.f32.mxu0 %v3135_v0 }
  0xa1   :  { %2458 = vmatprep.subr.bf16.mxu0 %v3247_v18 }
  0xa2   :  { %2452 = vmatpush3.bf16.msra.mxu1 %v3334_v32 }
  0xa3   :  { %2485 = vmatprep.subr.bf16.mxu1 %v3136_v40 }
  0xa4   :  { %2460 = vmatpush1.bf16.msra.mxu0 %v3252_v25 }
  0xa5   :  { %2462 = vmatprep.subr.bf16.mxu0 %v3255_v26  ;;  %2086 = vmatmul.mubr.f32.vlgmr.msra.gmra.mrb[8].mxu1 %v3135_v0 }
  0xa6   :  { %2487 = vmatpush3.bf16.msra.mxu1 %v3265_v41  ;;  %2120 = vmatprep.mubr.msk.f32.mxu1 %vm3137_vm0, %v3135_v0 }
  0xa7   :  { %2488 = vmatprep.subr.bf16.mxu1 %v3136_v40 }
  0xa8   :  { %2464 = vmatpush1.bf16.msra.mxu0 %v3259_v34 }
  0xa9   :  { %2466 = vmatprep.subr.bf16.mxu0 %v3262_v35 }
  0xaa   :  { %2490 = vmatpush3.bf16.msra.mxu1 %v3275_v51 }
  0xab   :  { %2491 = vmatprep.subr.bf16.mxu1 %v3136_v40 }
  0xac   :  { %2468 = vmatpush1.bf16.msra.mxu0 %v3269_v45 }
  0xad   :  { %2470 = vmatprep.subr.bf16.mxu0 %v3272_v46 }
  0xae   :  { %2493 = vmatpush3.bf16.msra.mxu1 %v3286_v61 }
  0xaf   :  { %2494 = vmatprep.subr.bf16.mxu1 %v3136_v40 }
  0xb0   :  { %2472 = vmatpush1.bf16.msra.mxu0 %v3280_v55 }
  0xb1   :  { %2474 = vmatprep.subr.bf16.mxu0 %v3283_v56 }
  0xb2   :  { %2496 = vmatpush3.bf16.msra.mxu1 %v3297_v10 }
  0xb3   :  { %2497 = vmatprep.subr.bf16.mxu1 %v3136_v40 }
  0xb4   :  { %2476 = vmatpush1.bf16.msra.mxu0 %v3291_v2 }
  0xb5   :  { %2478 = vmatprep.subr.bf16.mxu0 %v3294_v4 }
  0xb6   :  { %2499 = vmatpush3.bf16.msra.mxu1 %v3308_v20 }
  0xb7   :  { %2500 = vmatprep.subr.bf16.mxu1 %v3136_v40 }
  0xb8   :  { %2480 = vmatpush1.bf16.msra.mxu0 %v3302_v13 }
  0xb9   :  { %2482 = vmatprep.subr.bf16.mxu0 %v3305_v15 }
  0xba   :  { %2502 = vmatpush3.bf16.msra.mxu1 %v3319_v24 }
  0xbb   :  { %2503 = vmatprep.subr.bf16.mxu1 %v3136_v40 }
  0xbc   :  { %2484 = vmatpush1.bf16.msra.mxu0 %v3315_v23 }
  0xbd   :  { %2510 = vmatprep.subr.bf16.mxu0 %v3242_v9 }
  0xbe   :  { %2505 = vmatpush3.bf16.msra.mxu1 %v3326_v29 }
  0xbf   :  { %2506 = vmatprep.subr.bf16.mxu1 %v3136_v40 }
  0xc2   :  { %2508 = vmatpush3.bf16.msra.mxu1 %v3334_v32 }
  0xc3   :  { %2541 = vmatprep.subr.bf16.mxu1 %v3136_v40 }
 0x158   :  { %v2043_v42 = vpop.f32.mrb[0].mxu1 }
 0x159   :  { %v3372_v43 = vadd.f32 %v2043_v42, %v159_v39  ;;  %v342_v44 = vpop.f32.mrb[1].mxu1 }
 0x15c   :  { %v2046_v47 = vpop.f32.mrb[2].mxu1 }
 0x15d   :  { %v3374_v48 = vadd.f32 %v2046_v47, %v159_v39  ;;  %v352_v49 = vpop.f32.mrb[3].mxu1 }
 0x15e   :  { %v3376_v50 = vadd.f32 %v352_v49, %v159_v39 }
 0x160   :  { %v2049_v52 = vpop.f32.mrb[4].mxu1 }
 0x161   :  { %v3378_v53 = vadd.f32 %v2049_v52, %v159_v39  ;;  %v362_v54 = vpop.f32.mrb[5].mxu1  ;;  %v343_v52 = vadd.f32 %v342_v44, %v159_v39 }
 0x162   :  { %v3380_v57 = vadd.f32 %v362_v54, %v159_v39 }
 0x164   :  { %v2052_v60 = vpop.f32.mrb[6].mxu1 }
 0x165   :  { %v3382_v62 = vadd.f32 %v2052_v60, %v159_v39  ;;  %v372_v63 = vpop.f32.mrb[7].mxu1 }
 0x166   :  { %v3384_v3 = vadd.f32 %v372_v63, %v159_v39 }
 0x172   :  { %v540_v12 = vpop.f32.mrb[0].mxu0 }
 0x173   :  { %v2846_v16 = vadd.f32 %v3386_v11, %v540_v12  ;;  %v542_v19 = vpop.f32.mrb[1].mxu0 }
 0x174   :  { %v2848_v22 = vadd.f32 %v3388_v14, %v542_v19 }
 0x175   :  { %v1833_v21 = vmul.f32 -1.442695, %v2846_v16 }
 0x176   :  { %v1834_v27 = vmul.f32 -1.442695, %v2848_v22 }
 0x177   :  { %2906 = vpow2.f32 %v1833_v21 }
 0x178   :  { %v611_v28 = vpop.f32.mrb[8].mxu1  ;;  %2908 = vpow2.f32 %v1834_v27 }
 0x179   :  { %v2087_v30 = vpop.f32.mrb[9].mxu1  ;;  %v612_v47 = vadd.f32 %v611_v28, %v3392_v36 }
 0x181   :  { %v2907_v31 = vpop.eup %2906 }
 0x182   :  { %v619_v33 = vadd.f32 1.0, %v2907_v31  ;;  %v2909_v38 = vpop.eup %2908 }
 0x183   :  { %v626_v42 = vadd.f32 1.0, %v2909_v38 }
 0x184   :  { %2910 = vrcp.f32 %v619_v33 }
 0x185   :  { %2912 = vrcp.f32 %v626_v42 }
 0x18e   :  { %v2911_v49 = vpop.eup %2910 }
 0x18f   :  { %v629_v54 = vmul.f32 %v2911_v49, %v612_v47  ;;  %v2913_v60 = vpop.eup %2912 }
 0x190   :  { %v632_v63 = vsub.f32 1.0, %v2913_v60  ;;  %v634_v6 = vmul.f32 0.0, %v2913_v60 }
 0x191   :  { %v630_v58 = vadd.f32 %v629_v54, %v343_v52 }
 0x193   :  { %2914 = vtanh.f32 %v630_v58 }
 0x19d   :  { %v2915_v1 = vpop.eup %2914 }
 0x19e   :  { %v633_v5 = vmul.f32 %v2915_v1, %v632_v63 }
 0x1a0   :  { %v3395_v7 = vadd.f32 %v634_v6, %v633_v5 }
 0x1a2   :  { %636 = vst [vmem:[#allocation13] sm:$0xff] %v3395_v7  ;;  %706 = vmatmul.mubr.f32.vlgmr.msra.gmra.mrb[2].mxu0 %v3395_v7  ;;  %2121 = vmatmul.mubr.f32.vlgmr.msra.gmra.mrb[10].mxu1 %v3395_v7 }
 0x1a3   :  { %2512 = vmatpush1.bf16.msra.mxu0 %v3244_v17  ;;  %2543 = vmatpush3.bf16.msra.mxu1 %v3265_v41 }
 0x1a4   :  { %2514 = vmatprep.subr.bf16.mxu0 %v3247_v18  ;;  %2544 = vmatprep.subr.bf16.mxu1 %v3136_v40 }
 0x1a5   :  { %873 = vmatprep.mubr.f32.mxu0 %v3135_v0  ;;  %2155 = vmatprep.mubr.msk.f32.mxu1 %vm3137_vm0, %v3135_v0 }
 0x1a7   :  { %2516 = vmatpush1.bf16.msra.mxu0 %v3252_v25  ;;  %2546 = vmatpush3.bf16.msra.mxu1 %v3275_v51 }
 0x1a8   :  { %2518 = vmatprep.subr.bf16.mxu0 %v3255_v26  ;;  %2547 = vmatprep.subr.bf16.mxu1 %v3136_v40 }
 0x1ab   :  { %2520 = vmatpush1.bf16.msra.mxu0 %v3259_v34  ;;  %2549 = vmatpush3.bf16.msra.mxu1 %v3286_v61 }
 0x1ac   :  { %2522 = vmatprep.subr.bf16.mxu0 %v3262_v35  ;;  %2550 = vmatprep.subr.bf16.mxu1 %v3136_v40 }
 0x1af   :  { %2524 = vmatpush1.bf16.msra.mxu0 %v3269_v45  ;;  %2552 = vmatpush3.bf16.msra.mxu1 %v3297_v10 }
 0x1b0   :  { %2526 = vmatprep.subr.bf16.mxu0 %v3272_v46  ;;  %2553 = vmatprep.subr.bf16.mxu1 %v3136_v40 }
 0x1b3   :  { %2528 = vmatpush1.bf16.msra.mxu0 %v3280_v55  ;;  %2555 = vmatpush3.bf16.msra.mxu1 %v3308_v20 }
 0x1b4   :  { %2530 = vmatprep.subr.bf16.mxu0 %v3283_v56  ;;  %2556 = vmatprep.subr.bf16.mxu1 %v3136_v40 }
 0x1b7   :  { %2532 = vmatpush1.bf16.msra.mxu0 %v3291_v2  ;;  %2558 = vmatpush3.bf16.msra.mxu1 %v3319_v24 }
 0x1b8   :  { %2534 = vmatprep.subr.bf16.mxu0 %v3294_v4  ;;  %2559 = vmatprep.subr.bf16.mxu1 %v3136_v40 }
 0x1bb   :  { %2536 = vmatpush1.bf16.msra.mxu0 %v3302_v13  ;;  %2561 = vmatpush3.bf16.msra.mxu1 %v3326_v29 }
 0x1bc   :  { %2538 = vmatprep.subr.bf16.mxu0 %v3305_v15  ;;  %2562 = vmatprep.subr.bf16.mxu1 %v3136_v40 }
 0x1bf   :  { %2540 = vmatpush1.bf16.msra.mxu0 %v3315_v23  ;;  %2564 = vmatpush3.bf16.msra.mxu1 %v3334_v32 }
 0x1c0   :  { %2566 = vmatprep.subr.bf16.mxu0 %v3242_v9  ;;  %2597 = vmatprep.subr.bf16.mxu1 %v3136_v40 }
 0x275   :  { %v707_v37 = vpop.f32.mrb[2].mxu0  ;;  %v778_v39 = vpop.f32.mrb[10].mxu1 }
 0x276   :  { %v2850_v44 = vadd.f32 %v3386_v11, %v707_v37  ;;  %v709_v59 = vpop.f32.mrb[3].mxu0  ;;  %v2122_v8 = vpop.f32.mrb[11].mxu1  ;;  %v779_v30 = vadd.f32 %v778_v39, %v3392_v36 }
 0x277   :  { %v2852_v16 = vadd.f32 %v3388_v14, %v709_v59 }
 0x278   :  { %v1835_v12 = vmul.f32 -1.442695, %v2850_v44 }
 0x279   :  { %v1836_v19 = vmul.f32 -1.442695, %v2852_v16 }
 0x27a   :  { %2916 = vpow2.f32 %v1835_v12 }
 0x27b   :  { %2918 = vpow2.f32 %v1836_v19 }
 0x284   :  { %v2917_v21 = vpop.eup %2916 }
 0x285   :  { %v786_v22 = vadd.f32 1.0, %v2917_v21  ;;  %v2919_v27 = vpop.eup %2918 }
 0x286   :  { %v793_v28 = vadd.f32 1.0, %v2919_v27 }
 0x287   :  { %2920 = vrcp.f32 %v786_v22 }
 0x288   :  { %2922 = vrcp.f32 %v793_v28 }
 0x291   :  { %v2921_v31 = vpop.eup %2920 }
 0x292   :  { %v796_v33 = vmul.f32 %v2921_v31, %v779_v30  ;;  %v2923_v42 = vpop.eup %2922 }
 0x293   :  { %v799_v47 = vsub.f32 1.0, %v2923_v42  ;;  %v801_v54 = vmul.f32 %v2923_v42, %v3395_v7 }
 0x294   :  { %v797_v38 = vadd.f32 %v796_v33, %v3372_v43 }
 0x296   :  { %2924 = vtanh.f32 %v797_v38 }
 0x2a0   :  { %v2925_v49 = vpop.eup %2924 }
 0x2a1   :  { %v800_v52 = vmul.f32 %v2925_v49, %v799_v47 }
 0x2a3   :  { %v3440_v58 = vadd.f32 %v801_v54, %v800_v52 }
 0x2a5   :  { %804 = vst [vmem:[#allocation13 + $0x8] sm:$0xff] %v3440_v58  ;;  %874 = vmatmul.mubr.f32.vlgmr.msra.gmra.mrb[4].mxu0 %v3440_v58  ;;  %2156 = vmatmul.mubr.f32.vlgmr.msra.gmra.mrb[12].mxu1 %v3440_v58 }
 0x2a6   :  { %2568 = vmatpush1.bf16.msra.mxu0 %v3244_v17  ;;  %2599 = vmatpush3.bf16.msra.mxu1 %v3265_v41 }
 0x2a7   :  { %2570 = vmatprep.subr.bf16.mxu0 %v3247_v18  ;;  %2600 = vmatprep.subr.bf16.mxu1 %v3136_v40 }
 0x2a8   :  { %1041 = vmatprep.mubr.f32.mxu0 %v3135_v0  ;;  %2190 = vmatprep.mubr.msk.f32.mxu1 %vm3137_vm0, %v3135_v0 }
 0x2aa   :  { %2572 = vmatpush1.bf16.msra.mxu0 %v3252_v25  ;;  %2602 = vmatpush3.bf16.msra.mxu1 %v3275_v51 }
 0x2ab   :  { %2574 = vmatprep.subr.bf16.mxu0 %v3255_v26  ;;  %2603 = vmatprep.subr.bf16.mxu1 %v3136_v40 }
 0x2ae   :  { %2576 = vmatpush1.bf16.msra.mxu0 %v3259_v34  ;;  %2605 = vmatpush3.bf16.msra.mxu1 %v3286_v61 }
 0x2af   :  { %2578 = vmatprep.subr.bf16.mxu0 %v3262_v35  ;;  %2606 = vmatprep.subr.bf16.mxu1 %v3136_v40 }
 0x2b2   :  { %2580 = vmatpush1.bf16.msra.mxu0 %v3269_v45  ;;  %2608 = vmatpush3.bf16.msra.mxu1 %v3297_v10 }
 0x2b3   :  { %2582 = vmatprep.subr.bf16.mxu0 %v3272_v46  ;;  %2609 = vmatprep.subr.bf16.mxu1 %v3136_v40 }
 0x2b6   :  { %2584 = vmatpush1.bf16.msra.mxu0 %v3280_v55  ;;  %2611 = vmatpush3.bf16.msra.mxu1 %v3308_v20 }
 0x2b7   :  { %2586 = vmatprep.subr.bf16.mxu0 %v3283_v56  ;;  %2612 = vmatprep.subr.bf16.mxu1 %v3136_v40 }
 0x2ba   :  { %2588 = vmatpush1.bf16.msra.mxu0 %v3291_v2  ;;  %2614 = vmatpush3.bf16.msra.mxu1 %v3319_v24 }
 0x2bb   :  { %2590 = vmatprep.subr.bf16.mxu0 %v3294_v4  ;;  %2615 = vmatprep.subr.bf16.mxu1 %v3136_v40 }
 0x2be   :  { %2592 = vmatpush1.bf16.msra.mxu0 %v3302_v13  ;;  %2617 = vmatpush3.bf16.msra.mxu1 %v3326_v29 }
 0x2bf   :  { %2594 = vmatprep.subr.bf16.mxu0 %v3305_v15  ;;  %2618 = vmatprep.subr.bf16.mxu1 %v3136_v40 }
 0x2c2   :  { %2596 = vmatpush1.bf16.msra.mxu0 %v3315_v23  ;;  %2620 = vmatpush3.bf16.msra.mxu1 %v3334_v32 }
 0x2c3   :  { %2622 = vmatprep.subr.bf16.mxu0 %v3242_v9  ;;  %2653 = vmatprep.subr.bf16.mxu1 %v3136_v40 }
 0x378   :  { %v875_v43 = vpop.f32.mrb[4].mxu0  ;;  %v946_v60 = vpop.f32.mrb[12].mxu1 }
 0x379   :  { %v2854_v63 = vadd.f32 %v3386_v11, %v875_v43  ;;  %v877_v1 = vpop.f32.mrb[5].mxu0  ;;  %v2157_v5 = vpop.f32.mrb[13].mxu1  ;;  %v947_v12 = vadd.f32 %v946_v60, %v3392_v36 }
 0x37a   :  { %v2856_v7 = vadd.f32 %v3388_v14, %v877_v1 }
 0x37b   :  { %v1837_v6 = vmul.f32 -1.442695, %v2854_v63 }
 0x37c   :  { %v1838_v37 = vmul.f32 -1.442695, %v2856_v7 }
 0x37d   :  { %2926 = vpow2.f32 %v1837_v6 }
 0x37e   :  { %2928 = vpow2.f32 %v1838_v37 }
 0x387   :  { %v2927_v39 = vpop.eup %2926 }
 0x388   :  { %v954_v44 = vadd.f32 1.0, %v2927_v39  ;;  %v2929_v59 = vpop.eup %2928 }
 0x389   :  { %v961_v8 = vadd.f32 1.0, %v2929_v59 }
 0x38a   :  { %2930 = vrcp.f32 %v954_v44 }
 0x38b   :  { %2932 = vrcp.f32 %v961_v8 }
 0x394   :  { %v2931_v16 = vpop.eup %2930 }
 0x395   :  { %v964_v19 = vmul.f32 %v2931_v16, %v947_v12  ;;  %v2933_v22 = vpop.eup %2932 }
 0x396   :  { %v967_v27 = vsub.f32 1.0, %v2933_v22  ;;  %v969_v31 = vmul.f32 %v2933_v22, %v3440_v58 }
 0x397   :  { %v965_v21 = vadd.f32 %v964_v19, %v3376_v50 }
 0x399   :  { %2934 = vtanh.f32 %v965_v21 }
 0x3a3   :  { %v2935_v28 = vpop.eup %2934 }
 0x3a4   :  { %v968_v30 = vmul.f32 %v2935_v28, %v967_v27 }
 0x3a6   :  { %v3485_v33 = vadd.f32 %v969_v31, %v968_v30 }
 0x3a8   :  { %972 = vst [vmem:[#allocation13 + $0x10] sm:$0xff] %v3485_v33  ;;  %1042 = vmatmul.mubr.f32.vlgmr.msra.gmra.mrb[6].mxu0 %v3485_v33  ;;  %2191 = vmatmul.mubr.f32.vlgmr.msra.gmra.mrb[14].mxu1 %v3485_v33 }
 0x3a9   :  { %2624 = vmatpush1.bf16.msra.mxu0 %v3244_v17  ;;  %2655 = vmatpush3.bf16.msra.mxu1 %v3265_v41 }
 0x3aa   :  { %2626 = vmatprep.subr.bf16.mxu0 %v3247_v18  ;;  %2656 = vmatprep.subr.bf16.mxu1 %v3136_v40 }
 0x3ab   :  { %1209 = vmatprep.mubr.f32.mxu0 %v3135_v0  ;;  %2225 = vmatprep.mubr.msk.f32.mxu1 %vm3137_vm0, %v3135_v0 }
 0x3ad   :  { %2628 = vmatpush1.bf16.msra.mxu0 %v3252_v25  ;;  %2658 = vmatpush3.bf16.msra.mxu1 %v3275_v51 }
 0x3ae   :  { %2630 = vmatprep.subr.bf16.mxu0 %v3255_v26  ;;  %2659 = vmatprep.subr.bf16.mxu1 %v3136_v40 }
 0x3b1   :  { %2632 = vmatpush1.bf16.msra.mxu0 %v3259_v34  ;;  %2661 = vmatpush3.bf16.msra.mxu1 %v3286_v61 }
 0x3b2   :  { %2634 = vmatprep.subr.bf16.mxu0 %v3262_v35  ;;  %2662 = vmatprep.subr.bf16.mxu1 %v3136_v40 }
 0x3b5   :  { %2636 = vmatpush1.bf16.msra.mxu0 %v3269_v45  ;;  %2664 = vmatpush3.bf16.msra.mxu1 %v3297_v10 }
 0x3b6   :  { %2638 = vmatprep.subr.bf16.mxu0 %v3272_v46  ;;  %2665 = vmatprep.subr.bf16.mxu1 %v3136_v40 }
 0x3b9   :  { %2640 = vmatpush1.bf16.msra.mxu0 %v3280_v55  ;;  %2667 = vmatpush3.bf16.msra.mxu1 %v3308_v20 }
 0x3ba   :  { %2642 = vmatprep.subr.bf16.mxu0 %v3283_v56  ;;  %2668 = vmatprep.subr.bf16.mxu1 %v3136_v40 }
 0x3bd   :  { %2644 = vmatpush1.bf16.msra.mxu0 %v3291_v2  ;;  %2670 = vmatpush3.bf16.msra.mxu1 %v3319_v24 }
 0x3be   :  { %2646 = vmatprep.subr.bf16.mxu0 %v3294_v4  ;;  %2671 = vmatprep.subr.bf16.mxu1 %v3136_v40 }
 0x3c1   :  { %2648 = vmatpush1.bf16.msra.mxu0 %v3302_v13  ;;  %2673 = vmatpush3.bf16.msra.mxu1 %v3326_v29 }
 0x3c2   :  { %2650 = vmatprep.subr.bf16.mxu0 %v3305_v15  ;;  %2674 = vmatprep.subr.bf16.mxu1 %v3136_v40 }
 0x3c5   :  { %2652 = vmatpush1.bf16.msra.mxu0 %v3315_v23  ;;  %2676 = vmatpush3.bf16.msra.mxu1 %v3334_v32 }
 0x3c6   :  { %2678 = vmatprep.subr.bf16.mxu0 %v3242_v9  ;;  %2709 = vmatprep.subr.bf16.mxu1 %v3136_v40 }
 0x47b   :  { %v1043_v50 = vpop.f32.mrb[6].mxu0  ;;  %v1114_v38 = vpop.f32.mrb[14].mxu1 }
 0x47c   :  { %v2858_v42 = vadd.f32 %v3386_v11, %v1043_v50  ;;  %v1045_v47 = vpop.f32.mrb[7].mxu0  ;;  %v2192_v49 = vpop.f32.mrb[15].mxu1  ;;  %v1115_v5 = vadd.f32 %v1114_v38, %v3392_v36 }
 0x47d   :  { %v2860_v54 = vadd.f32 %v3388_v14, %v1045_v47 }
 0x47e   :  { %v1839_v52 = vmul.f32 -1.442695, %v2858_v42 }
 0x47f   :  { %v1840_v58 = vmul.f32 -1.442695, %v2860_v54 }
 0x480   :  { %2936 = vpow2.f32 %v1839_v52 }
 0x481   :  { %2938 = vpow2.f32 %v1840_v58 }
 0x48a   :  { %v2937_v43 = vpop.eup %2936 }
 0x48b   :  { %v1122_v60 = vadd.f32 1.0, %v2937_v43  ;;  %v2939_v63 = vpop.eup %2938 }
 0x48c   :  { %v1129_v1 = vadd.f32 1.0, %v2939_v63 }
 0x48d   :  { %2940 = vrcp.f32 %v1122_v60 }
 0x48e   :  { %2942 = vrcp.f32 %v1129_v1 }
 0x497   :  { %v2941_v6 = vpop.eup %2940 }
 0x498   :  { %v1132_v7 = vmul.f32 %v2941_v6, %v1115_v5  ;;  %v2943_v39 = vpop.eup %2942 }
 0x499   :  { %v1135_v44 = vsub.f32 1.0, %v2943_v39  ;;  %v1137_v12 = vmul.f32 %v2943_v39, %v3485_v33 }
 0x49a   :  { %v1133_v37 = vadd.f32 %v1132_v7, %v3374_v48 }
 0x49c   :  { %2944 = vtanh.f32 %v1133_v37 }
 0x4a6   :  { %v2945_v59 = vpop.eup %2944 }
 0x4a7   :  { %v1136_v8 = vmul.f32 %v2945_v59, %v1135_v44 }
 0x4a9   :  { %v3530_v16 = vadd.f32 %v1137_v12, %v1136_v8 }
 0x4ab   :  { %1140 = vst [vmem:[#allocation13 + $0x18] sm:$0xff] %v3530_v16  ;;  %1210 = vmatmul.mubr.f32.vlgmr.msra.gmra.mrb[8].mxu0 %v3530_v16  ;;  %2226 = vmatmul.mubr.f32.vlgmr.msra.gmra.mrb[16].mxu1 %v3530_v16 }
 0x4ac   :  { %2680 = vmatpush1.bf16.msra.mxu0 %v3244_v17  ;;  %2711 = vmatpush3.bf16.msra.mxu1 %v3265_v41 }
 0x4ad   :  { %2682 = vmatprep.subr.bf16.mxu0 %v3247_v18  ;;  %2712 = vmatprep.subr.bf16.mxu1 %v3136_v40 }
 0x4ae   :  { %1377 = vmatprep.mubr.f32.mxu0 %v3135_v0  ;;  %2260 = vmatprep.mubr.msk.f32.mxu1 %vm3137_vm0, %v3135_v0 }
 0x4b0   :  { %2684 = vmatpush1.bf16.msra.mxu0 %v3252_v25  ;;  %2714 = vmatpush3.bf16.msra.mxu1 %v3275_v51 }
 0x4b1   :  { %2686 = vmatprep.subr.bf16.mxu0 %v3255_v26  ;;  %2715 = vmatprep.subr.bf16.mxu1 %v3136_v40 }
 0x4b4   :  { %2688 = vmatpush1.bf16.msra.mxu0 %v3259_v34  ;;  %2717 = vmatpush3.bf16.msra.mxu1 %v3286_v61 }
 0x4b5   :  { %2690 = vmatprep.subr.bf16.mxu0 %v3262_v35  ;;  %2718 = vmatprep.subr.bf16.mxu1 %v3136_v40 }
 0x4b8   :  { %2692 = vmatpush1.bf16.msra.mxu0 %v3269_v45  ;;  %2720 = vmatpush3.bf16.msra.mxu1 %v3297_v10 }
 0x4b9   :  { %2694 = vmatprep.subr.bf16.mxu0 %v3272_v46  ;;  %2721 = vmatprep.subr.bf16.mxu1 %v3136_v40 }
 0x4bc   :  { %2696 = vmatpush1.bf16.msra.mxu0 %v3280_v55  ;;  %2723 = vmatpush3.bf16.msra.mxu1 %v3308_v20 }
 0x4bd   :  { %2698 = vmatprep.subr.bf16.mxu0 %v3283_v56  ;;  %2724 = vmatprep.subr.bf16.mxu1 %v3136_v40 }
 0x4c0   :  { %2700 = vmatpush1.bf16.msra.mxu0 %v3291_v2  ;;  %2726 = vmatpush3.bf16.msra.mxu1 %v3319_v24 }
 0x4c1   :  { %2702 = vmatprep.subr.bf16.mxu0 %v3294_v4  ;;  %2727 = vmatprep.subr.bf16.mxu1 %v3136_v40 }
 0x4c4   :  { %2704 = vmatpush1.bf16.msra.mxu0 %v3302_v13  ;;  %2729 = vmatpush3.bf16.msra.mxu1 %v3326_v29 }
 0x4c5   :  { %2706 = vmatprep.subr.bf16.mxu0 %v3305_v15  ;;  %2730 = vmatprep.subr.bf16.mxu1 %v3136_v40 }
 0x4c8   :  { %2708 = vmatpush1.bf16.msra.mxu0 %v3315_v23  ;;  %2732 = vmatpush3.bf16.msra.mxu1 %v3334_v32 }
 0x4c9   :  { %2734 = vmatprep.subr.bf16.mxu0 %v3242_v9  ;;  %2765 = vmatprep.subr.bf16.mxu1 %v3136_v40 }
 0x57e   :  { %v1211_v48 = vpop.f32.mrb[8].mxu0  ;;  %v1282_v19 = vpop.f32.mrb[16].mxu1 }
 0x57f   :  { %v2862_v21 = vadd.f32 %v3386_v11, %v1211_v48  ;;  %v1213_v22 = vpop.f32.mrb[9].mxu0  ;;  %v2227_v27 = vpop.f32.mrb[17].mxu1  ;;  %v1283_v47 = vadd.f32 %v1282_v19, %v3392_v36 }
 0x580   :  { %v2864_v30 = vadd.f32 %v3388_v14, %v1213_v22 }
 0x581   :  { %v1841_v28 = vmul.f32 -1.442695, %v2862_v21 }
 0x582   :  { %v1842_v31 = vmul.f32 -1.442695, %v2864_v30 }
 0x583   :  { %2946 = vpow2.f32 %v1841_v28 }
 0x584   :  { %2948 = vpow2.f32 %v1842_v31 }
 0x58d   :  { %v2947_v33 = vpop.eup %2946 }
 0x58e   :  { %v1290_v50 = vadd.f32 1.0, %v2947_v33  ;;  %v2949_v38 = vpop.eup %2948 }
 0x58f   :  { %v1297_v42 = vadd.f32 1.0, %v2949_v38 }
 0x590   :  { %2950 = vrcp.f32 %v1290_v50 }
 0x591   :  { %2952 = vrcp.f32 %v1297_v42 }
 0x59a   :  { %v2951_v49 = vpop.eup %2950 }
 0x59b   :  { %v1300_v52 = vmul.f32 %v2951_v49, %v1283_v47  ;;  %v2953_v58 = vpop.eup %2952 }
 0x59c   :  { %v1303_v43 = vsub.f32 1.0, %v2953_v58  ;;  %v1305_v1 = vmul.f32 %v2953_v58, %v3530_v16 }
 0x59d   :  { %v1301_v54 = vadd.f32 %v1300_v52, %v3380_v57 }
 0x59f   :  { %2954 = vtanh.f32 %v1301_v54 }
 0x5a9   :  { %v2955_v60 = vpop.eup %2954 }
 0x5aa   :  { %v1304_v63 = vmul.f32 %v2955_v60, %v1303_v43 }
 0x5ac   :  { %v3575_v5 = vadd.f32 %v1305_v1, %v1304_v63 }
 0x5ae   :  { %1308 = vst [vmem:[#allocation13 + $0x20] sm:$0xff] %v3575_v5  ;;  %1378 = vmatmul.mubr.f32.vlgmr.msra.gmra.mrb[10].mxu0 %v3575_v5  ;;  %2261 = vmatmul.mubr.f32.vlgmr.msra.gmra.mrb[18].mxu1 %v3575_v5 }
 0x5af   :  { %2736 = vmatpush1.bf16.msra.mxu0 %v3244_v17  ;;  %2767 = vmatpush3.bf16.msra.mxu1 %v3265_v41 }
 0x5b0   :  { %2738 = vmatprep.subr.bf16.mxu0 %v3247_v18  ;;  %2768 = vmatprep.subr.bf16.mxu1 %v3136_v40 }
 0x5b1   :  { %1545 = vmatprep.mubr.f32.mxu0 %v3135_v0  ;;  %2295 = vmatprep.mubr.msk.f32.mxu1 %vm3137_vm0, %v3135_v0 }
 0x5b3   :  { %2740 = vmatpush1.bf16.msra.mxu0 %v3252_v25  ;;  %2770 = vmatpush3.bf16.msra.mxu1 %v3275_v51 }
 0x5b4   :  { %2742 = vmatprep.subr.bf16.mxu0 %v3255_v26  ;;  %2771 = vmatprep.subr.bf16.mxu1 %v3136_v40 }
 0x5b7   :  { %2744 = vmatpush1.bf16.msra.mxu0 %v3259_v34  ;;  %2773 = vmatpush3.bf16.msra.mxu1 %v3286_v61 }
 0x5b8   :  { %2746 = vmatprep.subr.bf16.mxu0 %v3262_v35  ;;  %2774 = vmatprep.subr.bf16.mxu1 %v3136_v40 }
 0x5bb   :  { %2748 = vmatpush1.bf16.msra.mxu0 %v3269_v45  ;;  %2776 = vmatpush3.bf16.msra.mxu1 %v3297_v10 }
 0x5bc   :  { %2750 = vmatprep.subr.bf16.mxu0 %v3272_v46  ;;  %2777 = vmatprep.subr.bf16.mxu1 %v3136_v40 }
 0x5bf   :  { %2752 = vmatpush1.bf16.msra.mxu0 %v3280_v55  ;;  %2779 = vmatpush3.bf16.msra.mxu1 %v3308_v20 }
 0x5c0   :  { %2754 = vmatprep.subr.bf16.mxu0 %v3283_v56  ;;  %2780 = vmatprep.subr.bf16.mxu1 %v3136_v40 }
 0x5c3   :  { %2756 = vmatpush1.bf16.msra.mxu0 %v3291_v2  ;;  %2782 = vmatpush3.bf16.msra.mxu1 %v3319_v24 }
 0x5c4   :  { %2758 = vmatprep.subr.bf16.mxu0 %v3294_v4  ;;  %2783 = vmatprep.subr.bf16.mxu1 %v3136_v40 }
 0x5c7   :  { %2760 = vmatpush1.bf16.msra.mxu0 %v3302_v13  ;;  %2785 = vmatpush3.bf16.msra.mxu1 %v3326_v29 }
 0x5c8   :  { %2762 = vmatprep.subr.bf16.mxu0 %v3305_v15  ;;  %2786 = vmatprep.subr.bf16.mxu1 %v3136_v40 }
 0x5cb   :  { %2764 = vmatpush1.bf16.msra.mxu0 %v3315_v23  ;;  %2788 = vmatpush3.bf16.msra.mxu1 %v3334_v32 }
 0x5cc   :  { %2790 = vmatprep.subr.bf16.mxu0 %v3242_v9  ;;  %2821 = vmatprep.subr.bf16.mxu1 %v3136_v40 }
 0x681   :  { %v1379_v57 = vpop.f32.mrb[10].mxu0  ;;  %v1450_v6 = vpop.f32.mrb[18].mxu1 }
 0x682   :  { %v2866_v7 = vadd.f32 %v3386_v11, %v1379_v57  ;;  %v1381_v37 = vpop.f32.mrb[11].mxu0  ;;  %v2262_v39 = vpop.f32.mrb[19].mxu1  ;;  %v1451_v9 = vadd.f32 %v1450_v6, %v3392_v36 }
 0x683   :  { %v2868_v59 = vadd.f32 %v3388_v14, %v1381_v37 }
 0x684   :  { %v1843_v44 = vmul.f32 -1.442695, %v2866_v7 }
 0x685   :  { %v1844_v8 = vmul.f32 -1.442695, %v2868_v59 }
 0x686   :  { %2956 = vpow2.f32 %v1843_v44 }
 0x687   :  { %2958 = vpow2.f32 %v1844_v8 }
 0x690   :  { %v2957_v12 = vpop.eup %2956 }
 0x691   :  { %v1458_v16 = vadd.f32 1.0, %v2957_v12  ;;  %v2959_v48 = vpop.eup %2958 }
 0x692   :  { %v1465_v19 = vadd.f32 1.0, %v2959_v48 }
 0x693   :  { %2960 = vrcp.f32 %v1458_v16 }
 0x694   :  { %2962 = vrcp.f32 %v1465_v19 }
 0x69d   :  { %v2961_v21 = vpop.eup %2960 }
 0x69e   :  { %v1468_v22 = vmul.f32 %v2961_v21, %v1451_v9  ;;  %v2963_v28 = vpop.eup %2962 }
 0x69f   :  { %v1471_v30 = vsub.f32 1.0, %v2963_v28  ;;  %v1473_v50 = vmul.f32 %v2963_v28, %v3575_v5 }
 0x6a0   :  { %v1469_v27 = vadd.f32 %v1468_v22, %v3378_v53 }
 0x6a2   :  { %2964 = vtanh.f32 %v1469_v27 }
 0x6ac   :  { %v2965_v31 = vpop.eup %2964 }
 0x6ad   :  { %v1472_v33 = vmul.f32 %v2965_v31, %v1471_v30 }
 0x6af   :  { %v1474_v38 = vadd.f32 %v1473_v50, %v1472_v33 }
 0x6b1   :  { %1476 = vst [vmem:[#allocation13 + $0x28] sm:$0xff] %v1474_v38  ;;  %1546 = vmatmul.mubr.f32.vlgmr.msra.gmra.mrb[12].mxu0 %v1474_v38  ;;  %2296 = vmatmul.mubr.f32.vlgmr.msra.gmra.mrb[20].mxu1 %v1474_v38 }
 0x6b2   :  { %2792 = vmatpush1.bf16.msra.mxu0 %v3244_v17  ;;  %2823 = vmatpush3.bf16.msra.mxu1 %v3265_v41 }
 0x6b3   :  { %2794 = vmatprep.subr.bf16.mxu0 %v3247_v18  ;;  %2824 = vmatprep.subr.bf16.mxu1 %v3136_v40 }
 0x6b4   :  { %1713 = vmatprep.mubr.f32.mxu0 %v3135_v0  ;;  %2330 = vmatprep.mubr.msk.f32.mxu1 %vm3137_vm0, %v3135_v0 }
 0x6b6   :  { %2796 = vmatpush1.bf16.msra.mxu0 %v3252_v25  ;;  %2826 = vmatpush3.bf16.msra.mxu1 %v3275_v51 }
 0x6b7   :  { %2798 = vmatprep.subr.bf16.mxu0 %v3255_v26  ;;  %2827 = vmatprep.subr.bf16.mxu1 %v3136_v40 }
 0x6ba   :  { %2800 = vmatpush1.bf16.msra.mxu0 %v3259_v34  ;;  %2829 = vmatpush3.bf16.msra.mxu1 %v3286_v61 }
 0x6bb   :  { %2802 = vmatprep.subr.bf16.mxu0 %v3262_v35  ;;  %2830 = vmatprep.subr.bf16.mxu1 %v3136_v40 }
 0x6be   :  { %2804 = vmatpush1.bf16.msra.mxu0 %v3269_v45  ;;  %2832 = vmatpush3.bf16.msra.mxu1 %v3297_v10 }
 0x6bf   :  { %2806 = vmatprep.subr.bf16.mxu0 %v3272_v46  ;;  %2833 = vmatprep.subr.bf16.mxu1 %v3136_v40 }
 0x6c2   :  { %2808 = vmatpush1.bf16.msra.mxu0 %v3280_v55  ;;  %2835 = vmatpush3.bf16.msra.mxu1 %v3308_v20 }
 0x6c3   :  { %2810 = vmatprep.subr.bf16.mxu0 %v3283_v56  ;;  %2836 = vmatprep.subr.bf16.mxu1 %v3136_v40 }
 0x6c6   :  { %2812 = vmatpush1.bf16.msra.mxu0 %v3291_v2  ;;  %2838 = vmatpush3.bf16.msra.mxu1 %v3319_v24 }
 0x6c7   :  { %2814 = vmatprep.subr.bf16.mxu0 %v3294_v4  ;;  %2839 = vmatprep.subr.bf16.mxu1 %v3136_v40 }
 0x6ca   :  { %2816 = vmatpush1.bf16.msra.mxu0 %v3302_v13  ;;  %2841 = vmatpush3.bf16.msra.mxu1 %v3326_v29 }
 0x6cb   :  { %2818 = vmatprep.subr.bf16.mxu0 %v3305_v15  ;;  %2842 = vmatprep.subr.bf16.mxu1 %v3136_v40 }
 0x6ce   :  { %2820 = vmatpush1.bf16.msra.mxu0 %v3315_v23  ;;  %2844 = vmatpush3.bf16.msra.mxu1 %v3334_v32 }
 0x784   :  { %v1547_v0 = vpop.f32.mrb[12].mxu0  ;;  %v1618_v17 = vpop.f32.mrb[20].mxu1 }
 0x785   :  { %v2870_v18 = vadd.f32 %v3386_v11, %v1547_v0  ;;  %v1549_v25 = vpop.f32.mrb[13].mxu0  ;;  %v2297_v26 = vpop.f32.mrb[21].mxu1  ;;  %v1619_v55 = vadd.f32 %v1618_v17, %v3392_v36 }
 0x786   :  { %v2872_v35 = vadd.f32 %v3388_v14, %v1549_v25 }
 0x787   :  { %v1845_v34 = vmul.f32 -1.442695, %v2870_v18 }
 0x788   :  { %v1846_v41 = vmul.f32 -1.442695, %v2872_v35 }
 0x789   :  { %2966 = vpow2.f32 %v1845_v34 }
 0x78a   :  { %2968 = vpow2.f32 %v1846_v41 }
 0x793   :  { %v2967_v45 = vpop.eup %2966 }
 0x794   :  { %v1626_v46 = vadd.f32 1.0, %v2967_v45  ;;  %v2969_v40 = vpop.eup %2968 }
 0x795   :  { %v1633_v51 = vadd.f32 1.0, %v2969_v40 }
 0x796   :  { %2970 = vrcp.f32 %v1626_v46 }
 0x797   :  { %2972 = vrcp.f32 %v1633_v51 }
 0x7a0   :  { %v2971_v56 = vpop.eup %2970 }
 0x7a1   :  { %v1636_v61 = vmul.f32 %v2971_v56, %v1619_v55  ;;  %v2973_v4 = vpop.eup %2972 }
 0x7a2   :  { %v1639_v10 = vsub.f32 1.0, %v2973_v4  ;;  %v1641_v20 = vmul.f32 %v2973_v4, %v1474_v38 }
 0x7a3   :  { %v1637_v2 = vadd.f32 %v1636_v61, %v3384_v3 }
 0x7a5   :  { %2974 = vtanh.f32 %v1637_v2 }
 0x7af   :  { %v2975_v13 = vpop.eup %2974 }
 0x7b0   :  { %v1640_v15 = vmul.f32 %v2975_v13, %v1639_v10 }
 0x7b2   :  { %v1642_v23 = vadd.f32 %v1641_v20, %v1640_v15 }
 0x7b4   :  { %1644 = vst [vmem:[#allocation13 + $0x30] sm:$0xff] %v1642_v23  ;;  %1714 = vmatmul.mubr.f32.vlgmr.msra.gmra.mrb[14].mxu0 %v1642_v23  ;;  %2331 = vmatmul.mubr.f32.vlgmr.msra.gmra.mrb[22].mxu1 %v1642_v23 }
 0x887   :  { %v1715_v24 = vpop.f32.mrb[14].mxu0  ;;  %v1786_v29 = vpop.f32.mrb[22].mxu1 }
 0x888   :  { %v2874_v32 = vadd.f32 %v3386_v11, %v1715_v24  ;;  %v1717_v53 = vpop.f32.mrb[15].mxu0  ;;  %v2332_v42 = vpop.f32.mrb[23].mxu1  ;;  %v1787_v60 = vadd.f32 %v1786_v29, %v3392_v36 }
 0x889   :  { %v2876_v49 = vadd.f32 %v3388_v14, %v1717_v53 }
 0x88a   :  { %v1847_v47 = vmul.f32 -1.442695, %v2874_v32 }
 0x88b   :  { %v1848_v3 = vmul.f32 -1.442695, %v2876_v49 }
 0x88c   :  { %2976 = vpow2.f32 %v1847_v47 }
 0x88d   :  { %2978 = vpow2.f32 %v1848_v3 }
 0x896   :  { %v2977_v52 = vpop.eup %2976 }
 0x897   :  { %v1794_v54 = vadd.f32 1.0, %v2977_v52  ;;  %v2979_v58 = vpop.eup %2978 }
 0x898   :  { %v1801_v43 = vadd.f32 1.0, %v2979_v58 }
 0x899   :  { %2980 = vrcp.f32 %v1794_v54 }
 0x89a   :  { %2982 = vrcp.f32 %v1801_v43 }
 0x8a3   :  { %v2981_v63 = vpop.eup %2980 }
 0x8a4   :  { %v1804_v1 = vmul.f32 %v2981_v63, %v1787_v60  ;;  %v2983_v5 = vpop.eup %2982 }
 0x8a5   :  { %v1807_v57 = vsub.f32 1.0, %v2983_v5  ;;  %v1809_v7 = vmul.f32 %v2983_v5, %v1642_v23 }
 0x8a6   :  { %v1805_v11 = vadd.f32 %v1804_v1, %v3382_v62 }
 0x8a8   :  { %2984 = vtanh.f32 %v1805_v11 }
 0x8b2   :  { %v2985_v6 = vpop.eup %2984 }
 0x8b3   :  { %v1808_v14 = vmul.f32 %v2985_v6, %v1807_v57 }
 0x8b5   :  { %v1810_v37 = vadd.f32 %v1809_v7, %v1808_v14 }
 0x8b7   :  { %1812 = vst [vmem:[#allocation13 + $0x38] sm:$0xff] %v1810_v37 }
 0x8b8   :  { %3107 = shalt.err (!%p3104_p2)
}
 0x8b9   :  { %s3108_s12 = scalar_lea.hbm %s3681_s5, 1024 }
 0x8ba   :  { %p3109_p3 = scmp.ne.s32.totalorder %s3681_s5, %s3108_s12  ;;  %p3112_p4 = scmp.lt.u32.totalorder %s3108_s12, %s3681_s5 }
 0x8bc   :  { %p3114_p5 = pnand %p3112_p4, %p3109_p3 }
 0x8be   :  { %3117 = shalt.err (!%p3114_p5)
}
 0x8bf   :  { %1825 = dma.vmem_to_hbm [thread:$0]  %s1820_s29, 1024, %s3681_s5, [#allocation6], %s3131_s3, %s3131_s3, %s3132_s6  }
 0x8c0   :  { %3124 = dma.done.wait [#allocation6], 1024  }
 0x8c1   :  { %3125 = vsyncadd [#allocation6], 4294966272 }
 0x8c2   :  { %1829 = vsyncpa [#allocation5], 1 }
 0x8c3   :  { %1830 = vsyncpa [#allocation8], 1 }
 0x8c4   :  { %1831 = vsyncpa [#allocation11], 1 }
 0x8c5   :  { %1832 = vsyncpa [#allocation6], 1 }

</bundles_post_ra>
